<compile_context>
chip_gen: v6e
topology: v6e:2x2x1
jax: 0.10.0
libtpu: 0.0.40
codegen_flags: <defaults>
</compile_context>

<pallas_src>
import functools

import jax
import jax.numpy as jnp
from jax.experimental import pallas as pl
from jax.experimental.pallas import tpu as pltpu


def _conv3x3_head_kernel(x_ref, w_ref, b_ref, o_ref, *, H, W):
    """One image of one feature level.

    x_ref : (1, H+2, W+2, Cin)  zero-padded NHWC feature map (native dtype)
    w_ref : (9, Cin, Cout)      fused cls+reg weights, tap k = dy*3 + dx
    b_ref : (1, Cout)           fused bias
    o_ref : (1, H*W, Cout)      conv output, rows ordered (h, w) == NHWC flatten
    """
    Cin = x_ref.shape[3]
    Cout = o_ref.shape[2]

    x = x_ref[0].astype(jnp.float32)                        # (H+2, W+2, Cin)

    acc = jnp.zeros((H * W, Cout), jnp.float32)
    for dy in range(3):
        for dx in range(3):
            patch = x[dy:dy + H, dx:dx + W, :]              # (H, W, Cin)
            patch2d = patch.reshape(H * W, Cin)             # Cin stays on lanes
            w_tap = w_ref[dy * 3 + dx].astype(jnp.float32)  # (Cin, Cout)
            acc = acc + jnp.dot(patch2d, w_tap,
                                preferred_element_type=jnp.float32)

    acc = acc + b_ref[...].astype(jnp.float32)              # (1, Cout) broadcast
    o_ref[0] = acc.astype(o_ref.dtype)


def _conv3x3_head(feature_nchw, w_cls, b_cls, w_reg, b_reg):
    """Fused cls+reg 3x3 'same' conv for one feature level.

    feature_nchw : (B, Cin, H, W)
    w_cls : (Cc, Cin, 3, 3), b_cls : (Cc,)
    w_reg : (Cr, Cin, 3, 3), b_reg : (Cr,)
    Returns (B, H*W, Cc + Cr); row p = h*W + w holds the NHWC channel vector.
    """
    B, Cin, H, W = feature_nchw.shape
    Cc = w_cls.shape[0]
    Cr = w_reg.shape[0]
    Cout = Cc + Cr

    # NHWC + spatial zero-pad of 1 (layout plumbing, native dtype, done once).
    x = jnp.transpose(feature_nchw, (0, 2, 3, 1))
    x = jnp.pad(x, ((0, 0), (1, 1), (1, 1), (0, 0)))

    # Fuse the two convs: (Cout, Cin, 3, 3) -> tap-major (9, Cin, Cout).
    w = jnp.concatenate([w_cls, w_reg], axis=0)
    w = jnp.transpose(w, (2, 3, 1, 0)).reshape(9, Cin, Cout)
    bias = jnp.concatenate([b_cls, b_reg], axis=0).reshape(1, Cout)

    kern = functools.partial(_conv3x3_head_kernel, H=H, W=W)
    out = pl.pallas_call(
        kern,
        out_shape=jax.ShapeDtypeStruct((B, H * W, Cout), feature_nchw.dtype),
        grid_spec=pltpu.PrefetchScalarGridSpec(
            num_scalar_prefetch=0,
            grid=(B,),
            in_specs=[
                pl.BlockSpec((1, H + 2, W + 2, Cin), lambda i: (i, 0, 0, 0)),
                pl.BlockSpec((9, Cin, Cout), lambda i: (0, 0, 0)),
                pl.BlockSpec((1, Cout), lambda i: (0, 0)),
            ],
            out_specs=pl.BlockSpec((1, H * W, Cout), lambda i: (i, 0, 0)),
        ),
        compiler_params=pltpu.CompilerParams(
            dimension_semantics=("parallel",)),
    )(x, w, bias)
    return out


def predictor_forward(features, params, num_classes):
    """Mirrors predictor.forward: per-level conv heads -> permute/flatten/concat."""
    cls_chunks, reg_chunks = [], []
    for feat, p in zip(features, params):
        B, _, H, W = feat.shape
        Cc = p["cls_w"].shape[0]
        bpl = Cc // num_classes
        out = _conv3x3_head(feat, p["cls_w"], p["cls_b"], p["reg_w"], p["reg_b"])
        # Column split == the two original convs; reshape == PyTorch
        # permute(0,2,3,1).view(B,-1) then view(B,-1,NC)/(B,-1,4).
        cls_chunks.append(out[:, :, :Cc].reshape(B, H * W * bpl, num_classes))
        reg_chunks.append(out[:, :, Cc:].reshape(B, H * W * bpl, 4))
    cls_logits = jnp.concatenate(cls_chunks, axis=1)
    bbox_pred = jnp.concatenate(reg_chunks, axis=1)
    return cls_logits, bbox_pred


def ref_predictor(features, params, num_classes):
    """Pure-JAX reference mirroring the PyTorch module semantics."""
    cls_list, reg_list = [], []
    B = features[0].shape[0]
    for feat, p in zip(features, params):
        cls = jax.lax.conv_general_dilated(
            feat, p["cls_w"], (1, 1), ((1, 1), (1, 1)),
            dimension_numbers=("NCHW", "OIHW", "NCHW"),
            precision=jax.lax.Precision.HIGHEST)
        cls = cls + p["cls_b"][None, :, None, None]
        reg = jax.lax.conv_general_dilated(
            feat, p["reg_w"], (1, 1), ((1, 1), (1, 1)),
            dimension_numbers=("NCHW", "OIHW", "NCHW"),
            precision=jax.lax.Precision.HIGHEST)
        reg = reg + p["reg_b"][None, :, None, None]
        cls_list.append(jnp.transpose(cls, (0, 2, 3, 1)).reshape(B, -1))
        reg_list.append(jnp.transpose(reg, (0, 2, 3, 1)).reshape(B, -1))
    cls_logits = jnp.concatenate(cls_list, axis=1).reshape(B, -1, num_classes)
    bbox_pred = jnp.concatenate(reg_list, axis=1).reshape(B, -1, 4)
    return cls_logits, bbox_pred


if __name__ == "__main__":
    key = jax.random.PRNGKey(0)
    B = 2
    NUM_CLASSES = 6
    # (in_channels, feature map H=W, boxes_per_location) per level (small SSD-like cfg).
    LEVEL_CFG = [(32, 16, 4), (64, 8, 6)]

    keys = jax.random.split(key, 1 + 3 * len(LEVEL_CFG))
    features, params = [], []
    ki = 1
    for cin, hw, bpl in LEVEL_CFG:
        feat = jax.random.normal(keys[ki], (B, cin, hw, hw), jnp.float32)
        ki += 1
        cc, cr = bpl * NUM_CLASSES, bpl * 4

        def xavier(k, cout, cin_=cin):
            fan_in, fan_out = cin_ * 9, cout * 9
            lim = (6.0 / (fan_in + fan_out)) ** 0.5
            return jax.random.uniform(k, (cout, cin_, 3, 3), jnp.float32, -lim, lim)

        params.append(dict(
            cls_w=xavier(keys[ki], cc), cls_b=jnp.zeros((cc,), jnp.float32),
            reg_w=xavier(keys[ki + 1], cr), reg_b=jnp.zeros((cr,), jnp.float32),
        ))
        ki += 2
        features.append(feat)

    cls_logits, bbox_pred = predictor_forward(features, params, NUM_CLASSES)
    jax.block_until_ready((cls_logits, bbox_pred))

    ref_cls, ref_reg = ref_predictor(features, params, NUM_CLASSES)
    num_priors = sum(h * h * b for _, h, b in LEVEL_CFG)
    assert cls_logits.shape == (B, num_priors, NUM_CLASSES), cls_logits.shape
    assert bbox_pred.shape == (B, num_priors, 4), bbox_pred.shape
    assert jnp.allclose(cls_logits, ref_cls, rtol=1e-3, atol=1e-3), \
        float(jnp.max(jnp.abs(cls_logits - ref_cls)))
    assert jnp.allclose(bbox_pred, ref_reg, rtol=1e-3, atol=1e-3), \
        float(jnp.max(jnp.abs(bbox_pred - ref_reg)))

    print("KERNEL_OK")
</pallas_src>

<mosaic_0001>
module attributes {stable_mosaic.version = 11 : i64} {
  func.func @_conv3x3_head_kernel(%arg0: i32, %arg1: memref<1x18x18x32xf32, #tpu.memory_space<vmem>>, %arg2: memref<9x32x40xf32, #tpu.memory_space<vmem>>, %arg3: memref<1x40xf32, #tpu.memory_space<vmem>>, %arg4: memref<1x256x40xf32, #tpu.memory_space<vmem>>) attributes {dimension_semantics = [#tpu.dimension_semantics<parallel>], iteration_bounds = array<i64: 2>, scalar_prefetch = 0 : i64, scratch_operands = 0 : i64, tpu.core_type = #tpu.core_type<tc>, window_params = [{transform_indices = @transform_0, window_bounds = array<i64: 1, 18, 18, 32>}, {pipeline_mode = #tpu.pipeline_mode<synchronous>, transform_indices = @transform_1, window_bounds = array<i64: 9, 32, 40>}, {pipeline_mode = #tpu.pipeline_mode<synchronous>, transform_indices = @transform_2, window_bounds = array<i64: 1, 40>}, {transform_indices = @transform_3, window_bounds = array<i64: 1, 256, 40>}]} {
    %c0 = arith.constant 0 : index
    %c0_0 = arith.constant 0 : index
    %c0_1 = arith.constant 0 : index
    %c0_2 = arith.constant 0 : index
    %0 = vector.load %arg1[%c0, %c0_0, %c0_1, %c0_2] : memref<1x18x18x32xf32, #tpu.memory_space<vmem>>, vector<1x18x18x32xf32>
    %1 = vector.shape_cast %0 : vector<1x18x18x32xf32> to vector<18x18x32xf32>
    %cst = arith.constant 0.000000e+00 : f32
    %2 = vector.broadcast %cst : f32 to vector<256x40xf32>
    %3 = vector.extract_strided_slice %1 {offsets = [0, 0, 0], sizes = [16, 16, 32], strides = [1, 1, 1]} : vector<18x18x32xf32> to vector<16x16x32xf32>
    %4 = vector.shape_cast %3 : vector<16x16x32xf32> to vector<256x32xf32>
    %c0_3 = arith.constant 0 : index
    %c0_4 = arith.constant 0 : index
    %c0_5 = arith.constant 0 : index
    %5 = vector.load %arg2[%c0_3, %c0_4, %c0_5] : memref<9x32x40xf32, #tpu.memory_space<vmem>>, vector<1x32x40xf32>
    %6 = vector.shape_cast %5 : vector<1x32x40xf32> to vector<32x40xf32>
    %cst_6 = arith.constant dense<0.000000e+00> : vector<256x40xf32>
    %7 = tpu.matmul %4, %6, %cst_6 {dimension_numbers = #tpu.dot_dimension_numbers<[1], [0], [0], [1], [0, 0, 1, 1], [], []>} : vector<256x32xf32>, vector<32x40xf32>, vector<256x40xf32> -> vector<256x40xf32>
    %8 = arith.addf %2, %7 : vector<256x40xf32>
    %9 = vector.extract_strided_slice %1 {offsets = [0, 1, 0], sizes = [16, 16, 32], strides = [1, 1, 1]} : vector<18x18x32xf32> to vector<16x16x32xf32>
    %10 = vector.shape_cast %9 : vector<16x16x32xf32> to vector<256x32xf32>
    %c1 = arith.constant 1 : index
    %c0_7 = arith.constant 0 : index
    %c0_8 = arith.constant 0 : index
    %11 = vector.load %arg2[%c1, %c0_7, %c0_8] : memref<9x32x40xf32, #tpu.memory_space<vmem>>, vector<1x32x40xf32>
    %12 = vector.shape_cast %11 : vector<1x32x40xf32> to vector<32x40xf32>
    %cst_9 = arith.constant dense<0.000000e+00> : vector<256x40xf32>
    %13 = tpu.matmul %10, %12, %cst_9 {dimension_numbers = #tpu.dot_dimension_numbers<[1], [0], [0], [1], [0, 0, 1, 1], [], []>} : vector<256x32xf32>, vector<32x40xf32>, vector<256x40xf32> -> vector<256x40xf32>
    %14 = arith.addf %8, %13 : vector<256x40xf32>
    %15 = vector.extract_strided_slice %1 {offsets = [0, 2, 0], sizes = [16, 16, 32], strides = [1, 1, 1]} : vector<18x18x32xf32> to vector<16x16x32xf32>
    %16 = vector.shape_cast %15 : vector<16x16x32xf32> to vector<256x32xf32>
    %c2 = arith.constant 2 : index
    %c0_10 = arith.constant 0 : index
    %c0_11 = arith.constant 0 : index
    %17 = vector.load %arg2[%c2, %c0_10, %c0_11] : memref<9x32x40xf32, #tpu.memory_space<vmem>>, vector<1x32x40xf32>
    %18 = vector.shape_cast %17 : vector<1x32x40xf32> to vector<32x40xf32>
    %cst_12 = arith.constant dense<0.000000e+00> : vector<256x40xf32>
    %19 = tpu.matmul %16, %18, %cst_12 {dimension_numbers = #tpu.dot_dimension_numbers<[1], [0], [0], [1], [0, 0, 1, 1], [], []>} : vector<256x32xf32>, vector<32x40xf32>, vector<256x40xf32> -> vector<256x40xf32>
    %20 = arith.addf %14, %19 : vector<256x40xf32>
    %21 = vector.extract_strided_slice %1 {offsets = [1, 0, 0], sizes = [16, 16, 32], strides = [1, 1, 1]} : vector<18x18x32xf32> to vector<16x16x32xf32>
    %22 = vector.shape_cast %21 : vector<16x16x32xf32> to vector<256x32xf32>
    %c3 = arith.constant 3 : index
    %c0_13 = arith.constant 0 : index
    %c0_14 = arith.constant 0 : index
    %23 = vector.load %arg2[%c3, %c0_13, %c0_14] : memref<9x32x40xf32, #tpu.memory_space<vmem>>, vector<1x32x40xf32>
    %24 = vector.shape_cast %23 : vector<1x32x40xf32> to vector<32x40xf32>
    %cst_15 = arith.constant dense<0.000000e+00> : vector<256x40xf32>
    %25 = tpu.matmul %22, %24, %cst_15 {dimension_numbers = #tpu.dot_dimension_numbers<[1], [0], [0], [1], [0, 0, 1, 1], [], []>} : vector<256x32xf32>, vector<32x40xf32>, vector<256x40xf32> -> vector<256x40xf32>
    %26 = arith.addf %20, %25 : vector<256x40xf32>
    %27 = vector.extract_strided_slice %1 {offsets = [1, 1, 0], sizes = [16, 16, 32], strides = [1, 1, 1]} : vector<18x18x32xf32> to vector<16x16x32xf32>
    %28 = vector.shape_cast %27 : vector<16x16x32xf32> to vector<256x32xf32>
    %c4 = arith.constant 4 : index
    %c0_16 = arith.constant 0 : index
    %c0_17 = arith.constant 0 : index
    %29 = vector.load %arg2[%c4, %c0_16, %c0_17] : memref<9x32x40xf32, #tpu.memory_space<vmem>>, vector<1x32x40xf32>
    %30 = vector.shape_cast %29 : vector<1x32x40xf32> to vector<32x40xf32>
    %cst_18 = arith.constant dense<0.000000e+00> : vector<256x40xf32>
    %31 = tpu.matmul %28, %30, %cst_18 {dimension_numbers = #tpu.dot_dimension_numbers<[1], [0], [0], [1], [0, 0, 1, 1], [], []>} : vector<256x32xf32>, vector<32x40xf32>, vector<256x40xf32> -> vector<256x40xf32>
    %32 = arith.addf %26, %31 : vector<256x40xf32>
    %33 = vector.extract_strided_slice %1 {offsets = [1, 2, 0], sizes = [16, 16, 32], strides = [1, 1, 1]} : vector<18x18x32xf32> to vector<16x16x32xf32>
    %34 = vector.shape_cast %33 : vector<16x16x32xf32> to vector<256x32xf32>
    %c5 = arith.constant 5 : index
    %c0_19 = arith.constant 0 : index
    %c0_20 = arith.constant 0 : index
    %35 = vector.load %arg2[%c5, %c0_19, %c0_20] : memref<9x32x40xf32, #tpu.memory_space<vmem>>, vector<1x32x40xf32>
    %36 = vector.shape_cast %35 : vector<1x32x40xf32> to vector<32x40xf32>
    %cst_21 = arith.constant dense<0.000000e+00> : vector<256x40xf32>
    %37 = tpu.matmul %34, %36, %cst_21 {dimension_numbers = #tpu.dot_dimension_numbers<[1], [0], [0], [1], [0, 0, 1, 1], [], []>} : vector<256x32xf32>, vector<32x40xf32>, vector<256x40xf32> -> vector<256x40xf32>
    %38 = arith.addf %32, %37 : vector<256x40xf32>
    %39 = vector.extract_strided_slice %1 {offsets = [2, 0, 0], sizes = [16, 16, 32], strides = [1, 1, 1]} : vector<18x18x32xf32> to vector<16x16x32xf32>
    %40 = vector.shape_cast %39 : vector<16x16x32xf32> to vector<256x32xf32>
    %c6 = arith.constant 6 : index
    %c0_22 = arith.constant 0 : index
    %c0_23 = arith.constant 0 : index
    %41 = vector.load %arg2[%c6, %c0_22, %c0_23] : memref<9x32x40xf32, #tpu.memory_space<vmem>>, vector<1x32x40xf32>
    %42 = vector.shape_cast %41 : vector<1x32x40xf32> to vector<32x40xf32>
    %cst_24 = arith.constant dense<0.000000e+00> : vector<256x40xf32>
    %43 = tpu.matmul %40, %42, %cst_24 {dimension_numbers = #tpu.dot_dimension_numbers<[1], [0], [0], [1], [0, 0, 1, 1], [], []>} : vector<256x32xf32>, vector<32x40xf32>, vector<256x40xf32> -> vector<256x40xf32>
    %44 = arith.addf %38, %43 : vector<256x40xf32>
    %45 = vector.extract_strided_slice %1 {offsets = [2, 1, 0], sizes = [16, 16, 32], strides = [1, 1, 1]} : vector<18x18x32xf32> to vector<16x16x32xf32>
    %46 = vector.shape_cast %45 : vector<16x16x32xf32> to vector<256x32xf32>
    %c7 = arith.constant 7 : index
    %c0_25 = arith.constant 0 : index
    %c0_26 = arith.constant 0 : index
    %47 = vector.load %arg2[%c7, %c0_25, %c0_26] : memref<9x32x40xf32, #tpu.memory_space<vmem>>, vector<1x32x40xf32>
    %48 = vector.shape_cast %47 : vector<1x32x40xf32> to vector<32x40xf32>
    %cst_27 = arith.constant dense<0.000000e+00> : vector<256x40xf32>
    %49 = tpu.matmul %46, %48, %cst_27 {dimension_numbers = #tpu.dot_dimension_numbers<[1], [0], [0], [1], [0, 0, 1, 1], [], []>} : vector<256x32xf32>, vector<32x40xf32>, vector<256x40xf32> -> vector<256x40xf32>
    %50 = arith.addf %44, %49 : vector<256x40xf32>
    %51 = vector.extract_strided_slice %1 {offsets = [2, 2, 0], sizes = [16, 16, 32], strides = [1, 1, 1]} : vector<18x18x32xf32> to vector<16x16x32xf32>
    %52 = vector.shape_cast %51 : vector<16x16x32xf32> to vector<256x32xf32>
    %c8 = arith.constant 8 : index
    %c0_28 = arith.constant 0 : index
    %c0_29 = arith.constant 0 : index
    %53 = vector.load %arg2[%c8, %c0_28, %c0_29] : memref<9x32x40xf32, #tpu.memory_space<vmem>>, vector<1x32x40xf32>
    %54 = vector.shape_cast %53 : vector<1x32x40xf32> to vector<32x40xf32>
    %cst_30 = arith.constant dense<0.000000e+00> : vector<256x40xf32>
    %55 = tpu.matmul %52, %54, %cst_30 {dimension_numbers = #tpu.dot_dimension_numbers<[1], [0], [0], [1], [0, 0, 1, 1], [], []>} : vector<256x32xf32>, vector<32x40xf32>, vector<256x40xf32> -> vector<256x40xf32>
    %56 = arith.addf %50, %55 : vector<256x40xf32>
    %c0_31 = arith.constant 0 : index
    %c0_32 = arith.constant 0 : index
    %57 = vector.load %arg3[%c0_31, %c0_32] : memref<1x40xf32, #tpu.memory_space<vmem>>, vector<1x40xf32>
    %58 = vector.broadcast %57 : vector<1x40xf32> to vector<256x40xf32>
    %59 = arith.addf %56, %58 : vector<256x40xf32>
    %c0_33 = arith.constant 0 : index
    %c0_34 = arith.constant 0 : index
    %c0_35 = arith.constant 0 : index
    %60 = vector.load %arg4[%c0_33, %c0_34, %c0_35] : memref<1x256x40xf32, #tpu.memory_space<vmem>>, vector<1x256x40xf32>
    %61 = vector.shape_cast %60 : vector<1x256x40xf32> to vector<256x40xf32>
    %62 = vector.shape_cast %59 : vector<256x40xf32> to vector<1x256x40xf32>
    tpu.vector_store %arg4[%c0_33, %c0_34, %c0_35], %62 {strides = array<i32>} : memref<1x256x40xf32, #tpu.memory_space<vmem>>, vector<1x256x40xf32>,
    return
  }
  func.func @transform_0(%arg0: i32) -> (i32, i32, i32, i32) {
    %c0_i32 = arith.constant 0 : i32
    %c0_i32_0 = arith.constant 0 : i32
    %c0_i32_1 = arith.constant 0 : i32
    %c0_i32_2 = arith.constant 0 : i32
    return %arg0, %c0_i32, %c0_i32_0, %c0_i32_1 : i32, i32, i32, i32
  }
  func.func @transform_1(%arg0: i32) -> (i32, i32, i32) {
    %c0_i32 = arith.constant 0 : i32
    %c0_i32_0 = arith.constant 0 : i32
    %c0_i32_1 = arith.constant 0 : i32
    %c0_i32_2 = arith.constant 0 : i32
    return %c0_i32, %c0_i32_0, %c0_i32_1 : i32, i32, i32
  }
  func.func @transform_2(%arg0: i32) -> (i32, i32) {
    %c0_i32 = arith.constant 0 : i32
    %c0_i32_0 = arith.constant 0 : i32
    %c0_i32_1 = arith.constant 0 : i32
    return %c0_i32, %c0_i32_0 : i32, i32
  }
  func.func @transform_3(%arg0: i32) -> (i32, i32, i32) {
    %c0_i32 = arith.constant 0 : i32
    %c0_i32_0 = arith.constant 0 : i32
    %c0_i32_1 = arith.constant 0 : i32
    return %arg0, %c0_i32, %c0_i32_0 : i32, i32, i32
  }
}

</mosaic_0001>

<bundles_post_ra>
// kernel: tpu_custom_call.1
= control target key start
LH: loop header
LB: loop body
LE: loop exit
PB: predicated region body
PF: predicated region fallthrough
CT: control target
= control target key end

     0   :  { %s4303_s12 = smov 0   ;;  %s6066_s0 = inlined_call_operand.vmem [shape: f32[2,18,18,32], index: 0, kind: input, shape index: {}]   ;;  %s6067_s1 = inlined_call_operand.vmem [shape: f32[9,32,40], index: 1, kind: input, shape index: {}]   ;;  %s6068_s2 = inlined_call_operand.vmem [shape: f32[1,40], index: 2, kind: input, shape index: {}]   ;;  %s6069_s3 = inlined_call_operand.vmem [shape: f32[2,256,40], index: 3, kind: output, shape index: {}]  }
   0x1 LB: > { %s3098_s13 = sadd.s32 4294967295, %s4281_s12   ;;  %p3102_p0 = scmp.ge.s32.totalorder %s4281_s12, 1  ;;  %s4281_s12 = sphi %s4303_s12, %s13_s12  }
   0x2   : > { %p137_p1 = scmp.lt.s32.totalorder %s4281_s12, 3 }
   0x4   : > { %p138_p2 = pnand %p3102_p0, %p137_p1 }
   0x6   : > { %141 = sbr.rel (%p138_p2) target bundleno = 510 (0x1fe), region = 32 }
   0xb   : > { %v3109_v0 = vld [vmem:[%s6067_s1 + $0x38] sm:$0xff]  ;;  %v3108_v1 = vld [vmem:[%s6067_s1 + $0x30] sm:$0xff]  ;;  %p161_p3 = scmp.lt.s32.totalorder %s3098_s13, 1  ;;  %v3107_v2 = vld [vmem:[%s6067_s1 + $0x28] sm:$0xff]  ;;  %vm277_vm0 = vcmask 1046528   ;;  %vm363_vm1 = vcmask 261120  }
   0xc   : > { %4258 = vmatprep.subr.mxu1 %v3109_v0  ;;  %3754 = vmatprep.subr.mxu0 %v3109_v0  ;;  %v3106_v3 = vld [vmem:[%s6067_s1 + $0x20] sm:$0xff]  ;;  %v228_v4 = vld [vmem:[%s6067_s1 + $0x18] sm:$0xff]  ;;  %v227_v24 = vld [vmem:[%s6067_s1 + $0x10] sm:$0xff]  ;;  %vm942_vm2 = vcmask 1045504   ;;  %vm3010_vm3 = vcmask 326656  }
   0xd   : > { %4262 = vmatpush3.msra.mxu1 %v3109_v0  ;;  %3755 = vmatpush3.msra.mxu0 %v3109_v0  ;;  %s6361_s13 = smov (!%p161_p3, %s3098_s13), 1  ;;  %v3177_v5 = vld [vmem:[%s6067_s1 + $0x58] sm:$0xff]  ;;  %v3176_v44 = vld [vmem:[%s6067_s1 + $0x50] sm:$0xff]  ;;  %v226_v52 = vld [vmem:[%s6067_s1 + $0x8] sm:$0xff] }
   0xe   : > { %4259 = vmatprep.subr.mxu1 %v3108_v1  ;;  %3756 = vmatprep.subr.mxu0 %v3108_v1  ;;  %s4266_s22 = smul.u32 432, %s6361_s13 }
   0xf   : > { %4263 = vmatpush3.msra.mxu1 %v3108_v1  ;;  %3757 = vmatpush3.msra.mxu0 %v3108_v1 }
  0x10   : > { %4260 = vmatprep.subr.mxu1 %v3107_v2  ;;  %3758 = vmatprep.subr.mxu0 %v3107_v2  ;;  %s4329_s25 = scalar_lea.vmem %s6066_s0, %s4266_s22 }
  0x11   : > { %4264 = vmatpush3.msra.mxu1 %v3107_v2  ;;  %3759 = vmatpush3.msra.mxu0 %v3107_v2  ;;  %v4338_v6 = vld [vmem:[%s4329_s25] sm:$0xff]  ;;  %v4341_v7 = vld [vmem:[%s4329_s25 + $0x8] sm:$0xff]  ;;  %v4353_v13 = vld [vmem:[%s4329_s25 + $0x10] sm:$0x3] }
  0x12   : > { %4261 = vmatprep.subr.mxu1 %v3106_v3  ;;  %3760 = vmatprep.subr.mxu0 %v3106_v3  ;;  %v4344_v8 = vld [vmem:[%s4329_s25 + $0xc0] sm:$0xff]  ;;  %v278_v9 = vrot.slane %v4338_v6, 1  ;;  %v279_v10 = vrot.slane %v4341_v7, 1  ;;  %v4349_v11 = vld [vmem:[%s4329_s25 + $0xc8] sm:$0xff]  ;;  %v281_v15 = vrot.slane %v4353_v13, 1  ;;  %v4361_v17 = vld [vmem:[%s4329_s25 + $0x18] sm:$0xff] }
  0x13   : > { %4265 = vmatpush3.msra.mxu1 %v3106_v3  ;;  %3761 = vmatpush3.msra.mxu0 %v3106_v3  ;;  %v318_v12 = vrot.slane %v4344_v8, 1  ;;  %v319_v14 = vrot.slane %v4349_v11, 1  ;;  %v4358_v16 = vld [vmem:[%s4329_s25 + $0xd0] sm:$0x3]  ;;  %v4366_v20 = vld [vmem:[%s4329_s25 + $0x20] sm:$0xff]  ;;  %v283_v21 = vrot.slane %v4361_v17, 1 }
  0x14   : > { %3810 = vmatprep.subr.mxu1 %v228_v4  ;;  %3866 = vmatprep.subr.mxu0 %v3177_v5  ;;  %v280_v18 = vsel %vm277_vm0, %v278_v9, %v279_v10  ;;  %v321_v19 = vrot.slane %v4358_v16, 1  ;;  %v4370_v22 = vld [vmem:[%s4329_s25 + $0xd8] sm:$0xff]  ;;  %v4373_v23 = vld [vmem:[%s4329_s25 + $0xe0] sm:$0xff]  ;;  %v282_v26 = vsel %vm277_vm0, %v279_v10, %v281_v15  ;;  %v284_v27 = vrot.slane %v4366_v20, 1  ;;  %v4386_v29 = vld [vmem:[%s4329_s25 + $0x28] sm:$0x3] }
  0x15   : > { %3762 = vmatprep.mubr.msk.f32.mxu0 %vm363_vm1, %v280_v18  ;;  %v4380_v25 = vsel %vm277_vm0, %v318_v12, %v319_v14  ;;  %v323_v28 = vrot.slane %v4370_v22, 1  ;;  %v4389_v30 = vld [vmem:[%s4329_s25 + $0xe8] sm:$0x3]  ;;  %v324_v32 = vrot.slane %v4373_v23, 1  ;;  %v286_v33 = vrot.slane %v4386_v29, 1  ;;  %v4401_v35 = vld [vmem:[%s4329_s25 + $0x30] sm:$0xff] }
  0x16   : > { %6152 = vst [vmem:[#allocation2_spill] sm:$0xff] %v4380_v25  ;;  %3786 = vmatprep.mubr.msk.f32.mxu1 %vm363_vm1, %v4380_v25  ;;  %3763 = vmatmul.mubr.msk.f32.vlgmr.msra.gmra.mxu0 %vm363_vm1, %v282_v26  ;;  %v4395_v31 = vsel %vm277_vm0, %v319_v14, %v321_v19  ;;  %v326_v34 = vrot.slane %v4389_v30, 1  ;;  %v4404_v36 = vld [vmem:[%s4329_s25 + $0x38] sm:$0xff]  ;;  %v4407_v37 = vld [vmem:[%s4329_s25 + $0xf0] sm:$0xff]  ;;  %v4412_v38 = vsel %vm277_vm0, %v283_v21, %v284_v27  ;;  %v288_v39 = vrot.slane %v4401_v35, 1  ;;  %v4442_v50 = vld [vmem:[%s4329_s25 + $0x48] sm:$0xff] }
  0x17   : > { %6153 = vst [vmem:[#allocation3_spill] sm:$0xff] %v4395_v31  ;;  %3787 = vmatmul.mubr.msk.f32.vlgmr.msra.gmra.mxu1 %vm363_vm1, %v4395_v31  ;;  %3867 = vmatpush3.msra.mxu0 %v3177_v5  ;;  %6154 = vst [vmem:[#allocation4_spill] sm:$0xff] %v4412_v38  ;;  %v289_v40 = vrot.slane %v4404_v36, 1  ;;  %v4417_v41 = vld [vmem:[%s4329_s25 + $0xf8] sm:$0xff]  ;;  %v328_v42 = vrot.slane %v4407_v37, 1  ;;  %v4429_v45 = vsel %vm277_vm0, %v323_v28, %v324_v32  ;;  %v4445_v51 = vld [vmem:[%s4329_s25 + $0x50] sm:$0xff] }
  0x18   : > { %v4421_v43 = vld [vmem:[%s4329_s25 + $0x40] sm:$0x3]  ;;  %3811 = vmatpush3.msra.mxu1 %v228_v4  ;;  %3765 = vmatprep.mubr.msk.f32.mxu0 %vm363_vm1, %v4412_v38  ;;  %6155 = vst [vmem:[#allocation5_spill] sm:$0xff] %v4429_v45  ;;  %v4432_v46 = vsel %vm277_vm0, %v284_v27, %v286_v33  ;;  %v4435_v47 = vsel %vm277_vm0, %v324_v32, %v326_v34  ;;  %v329_v48 = vrot.slane %v4417_v41, 1  ;;  %v293_v56 = vrot.slane %v4442_v50, 1  ;;  %v4459_v57 = vld [vmem:[%s4329_s25 + $0x108] sm:$0xff] }
  0x19   : > { %6156 = vst [vmem:[#allocation6_spill] sm:$0xff] %v4432_v46  ;;  %6157 = vst [vmem:[#allocation7_spill] sm:$0xff] %v4435_v47  ;;  %v4439_v49 = vld [vmem:[%s4329_s25 + $0x100] sm:$0x3]  ;;  %3789 = vmatprep.mubr.msk.f32.mxu1 %vm363_vm1, %v4429_v45  ;;  %v4453_v53 = vsel %vm277_vm0, %v288_v39, %v289_v40  ;;  %3812 = vmatprep.subr.mxu1 %v227_v24  ;;  %v291_v54 = vrot.slane %v4421_v43, 1  ;;  %v4462_v58 = vld [vmem:[%s4329_s25 + $0x110] sm:$0xff] }
  0x1a   : > { %6158 = vst [vmem:[#allocation8_spill] sm:$0xff] %v4453_v53  ;;  %v331_v55 = vrot.slane %v4439_v49, 1  ;;  %v4465_v59 = vld [vmem:[%s4329_s25 + $0x60] sm:$0xff]  ;;  %3766 = vmatmul.mubr.msk.f32.gmra.mxu0 %vm363_vm1, %v4432_v46  ;;  %v4470_v60 = vsel %vm277_vm0, %v328_v42, %v329_v48  ;;  %3813 = vmatpush3.msra.mxu1 %v227_v24  ;;  %v294_v61 = vrot.slane %v4445_v51, 1  ;;  %v333_v62 = vrot.slane %v4459_v57, 1  ;;  %v4479_v1 = vld [vmem:[%s4329_s25 + $0x68] sm:$0xff] }
  0x1b   : > { %6159 = vst [vmem:[#allocation9_spill] sm:$0xff] %v4470_v60  ;;  %v334_v63 = vrot.slane %v4462_v58, 1  ;;  %v4476_v0 = vld [vmem:[%s4329_s25 + $0x58] sm:$0x3]  ;;  %3790 = vmatmul.mubr.msk.f32.gmra.mxu1 %vm363_vm1, %v4435_v47  ;;  %3768 = vmatprep.mubr.msk.f32.mxu0 %vm363_vm1, %v4453_v53  ;;  %v4486_v2 = vsel %vm277_vm0, %v289_v40, %v291_v54  ;;  %v298_v5 = vrot.slane %v4465_v59, 1  ;;  %v4494_v9 = vld [vmem:[%s4329_s25 + $0x120] sm:$0xff] }
  0x1c   : > { %6160 = vst [vmem:[#allocation10_spill] sm:$0xff] %v4486_v2  ;;  %v296_v3 = vrot.slane %v4476_v0, 1  ;;  %v4490_v4 = vld [vmem:[%s4329_s25 + $0x118] sm:$0x3]  ;;  %v4497_v10 = vld [vmem:[%s4329_s25 + $0x128] sm:$0xff]  ;;  %3792 = vmatprep.mubr.msk.f32.mxu1 %vm363_vm1, %v4470_v60  ;;  %v4502_v12 = vsel %vm277_vm0, %v329_v48, %v331_v55  ;;  %3868 = vmatprep.subr.mxu0 %v3176_v44  ;;  %v4505_v14 = vsel %vm277_vm0, %v293_v56, %v294_v61  ;;  %v299_v18 = vrot.slane %v4479_v1, 1 }
  0x1d   : > { %6161 = vst [vmem:[#allocation11_spill] sm:$0xff] %v4502_v12  ;;  %6162 = vst [vmem:[#allocation12_spill] sm:$0xff] %v4505_v14  ;;  %v336_v15 = vrot.slane %v4490_v4, 1  ;;  %v4510_v19 = vld [vmem:[%s4329_s25 + $0x70] sm:$0x3]  ;;  %3869 = vmatpush3.msra.mxu0 %v3176_v44  ;;  %v4516_v24 = vsel %vm277_vm0, %v333_v62, %v334_v63  ;;  %v338_v26 = vrot.slane %v4494_v9, 1  ;;  %3814 = vmatprep.subr.mxu1 %v226_v52 }
  0x1e   : > { %v4513_v21 = vld [vmem:[%s4329_s25 + $0x130] sm:$0x3]  ;;  %6163 = vst [vmem:[#allocation13_spill] sm:$0xff] %v4516_v24  ;;  %v339_v27 = vrot.slane %v4497_v10, 1  ;;  %v3175_v28 = vld [vmem:[%s6067_s1 + $0x48] sm:$0xff]  ;;  %v4524_v32 = vld [vmem:[%s4329_s25 + $0x78] sm:$0xff]  ;;  %3769 = vmatmul.mubr.msk.f32.gmra.mxu0 %vm363_vm1, %v4486_v2  ;;  %3815 = vmatpush3.msra.mxu1 %v226_v52  ;;  %v4545_v42 = vsel %vm277_vm0, %v294_v61, %v296_v3  ;;  %v4555_v54 = vsel %vm277_vm0, %v298_v5, %v299_v18 }
  0x1f   : > { %v4527_v33 = vld [vmem:[%s4329_s25 + $0x80] sm:$0xff]  ;;  %v4532_v34 = vld [vmem:[%s4329_s25 + $0x138] sm:$0xff]  ;;  %3793 = vmatmul.mubr.msk.f32.gmra.mxu1 %vm363_vm1, %v4502_v12  ;;  %3771 = vmatprep.mubr.msk.f32.mxu0 %vm363_vm1, %v4505_v14  ;;  %6164 = vst [vmem:[#allocation14_spill] sm:$0xff] %v4545_v42  ;;  %v301_v44 = vrot.slane %v4510_v19, 1  ;;  %v341_v48 = vrot.slane %v4513_v21, 1  ;;  %v4552_v52 = vsel %vm277_vm0, %v334_v63, %v336_v15  ;;  %6166 = vst [vmem:[#allocation16_spill] sm:$0xff] %v4555_v54 }
  0x20   : > { %v4535_v39 = vld [vmem:[%s4329_s25 + $0x140] sm:$0xff]  ;;  %3795 = vmatprep.mubr.msk.f32.mxu1 %vm363_vm1, %v4516_v24  ;;  %6165 = vst [vmem:[#allocation15_spill] sm:$0xff] %v4552_v52  ;;  %3870 = vmatprep.subr.mxu0 %v3175_v28  ;;  %v303_v55 = vrot.slane %v4524_v32, 1  ;;  %v304_v56 = vrot.slane %v4527_v33, 1  ;;  %v4560_v61 = vld [vmem:[%s4329_s25 + $0x88] sm:$0x3]  ;;  %v4566_v3 = vsel %vm277_vm0, %v338_v26, %v339_v27 }
  0x21   : > { %v225_v40 = vld [vmem:[%s6067_s1] sm:$0xff]  ;;  %v4563_v62 = vld [vmem:[%s4329_s25 + $0x148] sm:$0x3]  ;;  %6167 = vst [vmem:[#allocation17_spill] sm:$0xff] %v4566_v3  ;;  %3871 = vmatpush3.msra.mxu0 %v3175_v28  ;;  %v343_v63 = vrot.slane %v4532_v34, 1  ;;  %v344_v15 = vrot.slane %v4535_v39, 1  ;;  %v4597_v47 = vsel %vm277_vm0, %v299_v18, %v301_v44 }
  0x22   : > { %v4571_v5 = vld [vmem:[%s4329_s25 + $0x90] sm:$0xff]  ;;  %v4574_v24 = vld [vmem:[%s4329_s25 + $0x98] sm:$0xff]  ;;  %3816 = vmatprep.subr.mxu1 %v225_v40  ;;  %v3174_v12 = vld [vmem:[%s6067_s1 + $0x40] sm:$0xff]  ;;  %3772 = vmatmul.mubr.msk.f32.gmra.mxu0 %vm363_vm1, %v4545_v42  ;;  %6169 = vst [vmem:[#allocation19_spill] sm:$0xff] %v4597_v47  ;;  %v306_v45 = vrot.slane %v4560_v61, 1  ;;  %v4612_v18 = vsel %vm277_vm0, %v303_v55, %v304_v56 }
  0x23   : > { %v4582_v26 = vld [vmem:[%s4329_s25 + $0x150] sm:$0xff]  ;;  %v4585_v28 = vld [vmem:[%s4329_s25 + $0x158] sm:$0xff]  ;;  %3817 = vmatpush3.msra.mxu1 %v225_v40  ;;  %3774 = vmatprep.mubr.msk.f32.mxu0 %vm363_vm1, %v4555_v54  ;;  %v346_v40 = vrot.slane %v4563_v62, 1  ;;  %6171 = vst [vmem:[#allocation21_spill] sm:$0xff] %v4612_v18  ;;  %v308_v44 = vrot.slane %v4571_v5, 1  ;;  %v309_v25 = vrot.slane %v4574_v24, 1  ;;  %v4620_v42 = vsel %vm277_vm0, %v343_v63, %v344_v15 }
  0x24   : > { %6168 = vst [vmem:[#allocation18_spill] sm:$0xff] %v4585_v28  ;;  %v4590_v60 = vld [vmem:[%s6067_s1 + $0x78] sm:$0xff]  ;;  %3796 = vmatmul.mubr.msk.f32.gmra.mxu1 %vm363_vm1, %v4552_v52  ;;  %v4609_v52 = vsel %vm277_vm0, %v339_v27, %v341_v48  ;;  %v4617_v54 = vld [vmem:[%s4329_s25 + $0xa0] sm:$0x3]  ;;  %3872 = vmatprep.subr.mxu0 %v3174_v12  ;;  %6172 = vst [vmem:[#allocation22_spill] sm:$0xff] %v4620_v42  ;;  %v349_v14 = vrot.slane %v4585_v28, 1 }
  0x25   : > { %v4604_v31 = vld [vmem:[%s6067_s1 + $0x98] sm:$0xff]  ;;  %3798 = vmatprep.mubr.msk.f32.mxu1 %vm363_vm1, %v4566_v3  ;;  %6170 = vst [vmem:[#allocation20_spill] sm:$0xff] %v4609_v52  ;;  %v348_v3 = vrot.slane %v4582_v26, 1  ;;  %v4625_v27 = vld [vmem:[%s4329_s25 + $0x160] sm:$0x3]  ;;  %3873 = vmatpush3.msra.mxu0 %v3174_v12  ;;  %v4628_v48 = vld [vmem:[%s4329_s25 + $0xa8] sm:$0xff]  ;;  %v4648_v12 = vsel %vm277_vm0, %v304_v56, %v306_v45  ;;  %v4651_v53 = vsel %vm277_vm0, %v344_v15, %v346_v40 }
  0x26   : > { %v4631_v55 = vld [vmem:[%s4329_s25 + $0xb0] sm:$0xff]  ;;  %3922 = vmatprep.subr.mxu1 %v4590_v60  ;;  %3775 = vmatmul.mubr.msk.f32.gmra.mxu0 %vm363_vm1, %v4597_v47  ;;  %v4637_v2 = vld [vmem:[%s4329_s25 + $0x168] sm:$0xff]  ;;  %6174 = vst [vmem:[#allocation24_spill] sm:$0xff] %v4648_v12  ;;  %6175 = vst [vmem:[#allocation25_spill] sm:$0xff] %v4651_v53  ;;  %v311_v47 = vrot.slane %v4617_v54, 1  ;;  %v4657_v46 = vsel %vm277_vm0, %v308_v44, %v309_v25  ;;  %v351_v38 = vrot.slane %v4625_v27, 1 }
  0x27   : > { %v4640_v63 = vld [vmem:[%s4329_s25 + $0x170] sm:$0xff]  ;;  %3978 = vmatprep.subr.mxu0 %v4604_v31  ;;  %3777 = vmatprep.mubr.msk.f32.mxu0 %vm363_vm1, %v4612_v18  ;;  %6176 = vst [vmem:[#allocation26_spill] sm:$0xff] %v4657_v46  ;;  %v314_v18 = vrot.slane %v4631_v55, 1  ;;  %v4663_v28 = vld [vmem:[%s4329_s25 + $0xb8] sm:$0x3]  ;;  %v4666_v45 = vsel %vm277_vm0, %v348_v3, %v349_v14  ;;  %v353_v56 = vrot.slane %v4637_v2, 1 }
  0x28   : > { %6173 = vst [vmem:[#allocation23_spill] sm:$0xff] %v4640_v63  ;;  %3799 = vmatmul.mubr.msk.f32.gmra.mxu1 %vm363_vm1, %v4609_v52  ;;  %v313_v52 = vrot.slane %v4628_v48, 1  ;;  %6177 = vst [vmem:[#allocation27_spill] sm:$0xff] %v4666_v45  ;;  %v354_v15 = vrot.slane %v4640_v63, 1  ;;  %v4671_v40 = vld [vmem:[%s4329_s25 + $0x178] sm:$0x3]  ;;  %v4680_v44 = vsel %vm277_vm0, %v309_v25, %v311_v47  ;;  %v4687_v63 = vsel %vm277_vm0, %v349_v14, %v351_v38 }
  0x29   : > { %3801 = vmatprep.mubr.msk.f32.mxu1 %vm363_vm1, %v4620_v42  ;;  %6178 = vst [vmem:[#allocation28_spill] sm:$0xff] %v4680_v44  ;;  %v316_v3 = vrot.slane %v4663_v28, 1  ;;  %v943_v42 = vrot.slane %v4338_v6, 2  ;;  %6179 = vst [vmem:[#allocation29_spill] sm:$0xff] %v4687_v63  ;;  %v946_v47 = vrot.slane %v4353_v13, 2  ;;  %v948_v13 = vrot.slane %v4361_v17, 2 }
  0x2a   : > { %3778 = vmatmul.mubr.msk.f32.gmra.mxu0 %vm363_vm1, %v4648_v12  ;;  %v4690_v12 = vsel %vm277_vm0, %v313_v52, %v314_v18  ;;  %v4695_v25 = vsel %vm277_vm0, %v353_v56, %v354_v15  ;;  %v949_v56 = vrot.slane %v4366_v20, 2 }
  0x2b   : > { %3780 = vmatprep.mubr.msk.f32.mxu0 %vm363_vm1, %v4657_v46  ;;  %6180 = vst [vmem:[#allocation30_spill] sm:$0xff] %v4690_v12  ;;  %v944_v46 = vrot.slane %v4341_v7, 2  ;;  %6181 = vst [vmem:[#allocation31_spill] sm:$0xff] %v4695_v25  ;;  %v4705_v38 = vsel %vm277_vm0, %v314_v18, %v316_v3  ;;  %v951_v3 = vrot.slane %v4386_v29, 2  ;;  %v956_v29 = vrot.slane %v4421_v43, 2 }
  0x2c   : > { %3802 = vmatmul.mubr.msk.f32.gmra.mxu1 %vm363_vm1, %v4651_v53  ;;  %v356_v53 = vrot.slane %v4671_v40, 1  ;;  %6182 = vst [vmem:[#allocation32_spill] sm:$0xff] %v4705_v38 }
  0x2d   : > { %3804 = vmatprep.mubr.msk.f32.mxu1 %vm363_vm1, %v4666_v45  ;;  %v945_v52 = vsel %vm942_vm2, %v943_v42, %v944_v46  ;;  %v947_v18 = vsel %vm942_vm2, %v944_v46, %v946_v47  ;;  %v954_v42 = vrot.slane %v4404_v36, 2  ;;  %v958_v47 = vrot.slane %v4442_v50, 2 }
  0x2e   : > { %3781 = vmatmul.mubr.msk.f32.gmra.mxu0 %vm363_vm1, %v4680_v44  ;;  %v4710_v14 = vsel %vm277_vm0, %v354_v15, %v356_v53  ;;  %v953_v53 = vrot.slane %v4401_v35, 2  ;;  %v4728_v15 = vsel %vm942_vm2, %v948_v13, %v949_v56  ;;  %v959_v13 = vrot.slane %v4445_v51, 2 }
  0x2f   : > { %3783 = vmatprep.mubr.msk.f32.mxu0 %vm363_vm1, %v4690_v12  ;;  %6183 = vst [vmem:[#allocation33_spill] sm:$0xff] %v4710_v14  ;;  %v4763_v43 = vsel %vm942_vm2, %v954_v42, %v956_v29 }
  0x30   : > { %3805 = vmatmul.mubr.msk.f32.gmra.mxu1 %vm363_vm1, %v4687_v63  ;;  %v4744_v46 = vsel %vm942_vm2, %v953_v53, %v954_v42  ;;  %v3247_v53 = vld [vmem:[%s6067_s1 + $0x88] sm:$0xff] }
  0x31   : > { %3807 = vmatprep.mubr.msk.f32.mxu1 %vm363_vm1, %v4695_v25 }
  0x32   : > { %3784 = vmatmul.mubr.msk.f32.gmra.mxu0 %vm363_vm1, %v4705_v38 }
  0x33   : > { %3874 = vmatprep.mubr.msk.f32.mxu0 %vm363_vm1, %v945_v52  ;;  %v3212_v52 = vld [vmem:[%s6067_s1 + $0x70] sm:$0xff] }
  0x34   : > { %3808 = vmatmul.mubr.msk.f32.gmra.mxu1 %vm363_vm1, %v4710_v14 }
  0x35   : > { %3818 = vmatprep.mubr.msk.f32.mxu1 %vm363_vm1, %v4338_v6  ;;  %v4737_v6 = vsel %vm942_vm2, %v949_v56, %v951_v3  ;;  %v4769_v56 = vsel %vm942_vm2, %v958_v47, %v959_v13  ;;  %v964_v3 = vrot.slane %v4479_v1, 2  ;;  %v968_v47 = vrot.slane %v4524_v32, 2 }
  0x36   : > { %3875 = vmatmul.mubr.msk.f32.vlgmr.msra.gmra.mxu0 %vm363_vm1, %v947_v18  ;;  %v963_v18 = vrot.slane %v4465_v59, 2 }
  0x37   : > { %3979 = vmatpush3.msra.mxu0 %v4604_v31  ;;  %3877 = vmatprep.mubr.msk.f32.mxu0 %vm363_vm1, %v4728_v15  ;;  %v3211_v31 = vld [vmem:[%s6067_s1 + $0x68] sm:$0xff] }
  0x38   : > { %3819 = vmatmul.mubr.msk.f32.vlgmr.msra.gmra.mxu1 %vm363_vm1, %v4341_v7  ;;  %v3248_v7 = vld [vmem:[%s6067_s1 + $0x90] sm:$0xff]  ;;  %v4792_v29 = vsel %vm942_vm2, %v963_v18, %v964_v3  ;;  %v4817_v18 = vld [vmem:[%s6067_s1 + $0xd8] sm:$0xff] }
  0x39   : > { %3923 = vmatpush3.msra.mxu1 %v4590_v60  ;;  %3821 = vmatprep.mubr.msk.f32.mxu1 %vm363_vm1, %v4361_v17  ;;  %v961_v60 = vrot.slane %v4476_v0, 2  ;;  %v3210_v0 = vld [vmem:[%s6067_s1 + $0x60] sm:$0xff]  ;;  %6184 = vst [vmem:[#allocation34_spill] sm:$0xff] %v4792_v29 }
  0x3a   : > { %3924 = vmatprep.subr.mxu1 %v3212_v52  ;;  %3878 = vmatmul.mubr.msk.f32.gmra.mxu0 %vm363_vm1, %v4737_v6 }
  0x3b   : > { %3925 = vmatpush3.msra.mxu1 %v3212_v52  ;;  %3880 = vmatprep.mubr.msk.f32.mxu0 %vm363_vm1, %v4744_v46  ;;  %v4786_v42 = vsel %vm942_vm2, %v959_v13, %v961_v60  ;;  %v966_v52 = vrot.slane %v4510_v19, 2  ;;  %v3246_v13 = vld [vmem:[%s6067_s1 + $0x80] sm:$0xff]  ;;  %v4804_v19 = vld [vmem:[%s6067_s1 + $0xb8] sm:$0xff]  ;;  %v971_v60 = vrot.slane %v4560_v61, 2 }
  0x3c   : > { %3822 = vmatmul.mubr.msk.f32.gmra.mxu1 %vm363_vm1, %v4366_v20  ;;  %3980 = vmatprep.subr.mxu0 %v3248_v7 }
  0x3d   : > { %3824 = vmatprep.mubr.msk.f32.mxu1 %vm363_vm1, %v4401_v35  ;;  %3981 = vmatpush3.msra.mxu0 %v3248_v7  ;;  %v969_v7 = vrot.slane %v4527_v33, 2 }
  0x3e   : > { %3926 = vmatprep.subr.mxu1 %v3211_v31  ;;  %3881 = vmatmul.mubr.msk.f32.gmra.mxu0 %vm363_vm1, %v4763_v43 }
  0x3f   : > { %3927 = vmatpush3.msra.mxu1 %v3211_v31  ;;  %3883 = vmatprep.mubr.msk.f32.mxu0 %vm363_vm1, %v4769_v56  ;;  %v4811_v31 = vsel %vm942_vm2, %v964_v3, %v966_v52  ;;  %v4835_v61 = vsel %vm942_vm2, %v969_v7, %v971_v60  ;;  %v976_v3 = vrot.slane %v4617_v54, 2 }
  0x40   : > { %3825 = vmatmul.mubr.msk.f32.gmra.mxu1 %vm363_vm1, %v4404_v36  ;;  %3982 = vmatprep.subr.mxu0 %v3247_v53  ;;  %6185 = vst [vmem:[#allocation35_spill] sm:$0xff] %v4835_v61 }
  0x41   : > { %3827 = vmatprep.mubr.msk.f32.mxu1 %vm363_vm1, %v4442_v50  ;;  %3983 = vmatpush3.msra.mxu0 %v3247_v53  ;;  %v4822_v53 = vsel %vm942_vm2, %v968_v47, %v969_v7  ;;  %v978_v47 = vrot.slane %v4628_v48, 2  ;;  %v981_v7 = vrot.slane %v4663_v28, 2 }
  0x42   : > { %3928 = vmatprep.subr.mxu1 %v3210_v0  ;;  %3884 = vmatmul.mubr.msk.f32.gmra.mxu0 %vm363_vm1, %v4786_v42 }
  0x43   : > { %3929 = vmatpush3.msra.mxu1 %v3210_v0  ;;  %3886 = vmatprep.mubr.msk.f32.mxu0 %vm363_vm1, %v4792_v29  ;;  %v973_v0 = vrot.slane %v4571_v5, 2  ;;  %v974_v29 = vrot.slane %v4574_v24, 2 }
  0x44   : > { %3828 = vmatmul.mubr.msk.f32.gmra.mxu1 %vm363_vm1, %v4445_v51  ;;  %3984 = vmatprep.subr.mxu0 %v3246_v13 }
  0x45   : > { %3830 = vmatprep.mubr.msk.f32.mxu1 %vm363_vm1, %v4465_v59  ;;  %3985 = vmatpush3.msra.mxu0 %v3246_v13  ;;  %v4841_v52 = vsel %vm942_vm2, %v973_v0, %v974_v29  ;;  %v979_v13 = vrot.slane %v4631_v55, 2  ;;  %v4852_v54 = vsel %vm942_vm2, %v974_v29, %v976_v3  ;;  %v983_v0 = vrot.slane %v4344_v8, 2 }
  0x46   : > { %4034 = vmatprep.subr.mxu1 %v4804_v19  ;;  %3887 = vmatmul.mubr.msk.f32.gmra.mxu0 %vm363_vm1, %v4811_v31  ;;  %6186 = vst [vmem:[#allocation36_spill] sm:$0xff] %v4852_v54  ;;  %v986_v29 = vrot.slane %v4358_v16, 2 }
  0x47   : > { %4090 = vmatprep.subr.mxu0 %v4817_v18  ;;  %3889 = vmatprep.mubr.msk.f32.mxu0 %vm363_vm1, %v4822_v53  ;;  %v4858_v60 = vsel %vm942_vm2, %v978_v47, %v979_v13  ;;  %v4869_v28 = vsel %vm942_vm2, %v979_v13, %v981_v7  ;;  %v988_v47 = vrot.slane %v4370_v22, 2  ;;  %v991_v13 = vrot.slane %v4389_v30, 2 }
  0x48   : > { %3831 = vmatmul.mubr.msk.f32.gmra.mxu1 %vm363_vm1, %v4479_v1  ;;  %6187 = vst [vmem:[#allocation37_spill] sm:$0xff] %v4869_v28 }
  0x49   : > { %3833 = vmatprep.mubr.msk.f32.mxu1 %vm363_vm1, %v4524_v32 }
  0x4a   : > { %3890 = vmatmul.mubr.msk.f32.gmra.mxu0 %vm363_vm1, %v4835_v61  ;;  %v984_v61 = vrot.slane %v4349_v11, 2 }
  0x4b   : > { %3892 = vmatprep.mubr.msk.f32.mxu0 %vm363_vm1, %v4841_v52 }
  0x4c   : > { %3834 = vmatmul.mubr.msk.f32.gmra.mxu1 %vm363_vm1, %v4527_v33  ;;  %v4875_v3 = vsel %vm942_vm2, %v983_v0, %v984_v61  ;;  %v4886_v16 = vsel %vm942_vm2, %v984_v61, %v986_v29  ;;  %v993_v0 = vrot.slane %v4407_v37, 2  ;;  %v996_v61 = vrot.slane %v4439_v49, 2 }
  0x4d   : > { %3836 = vmatprep.mubr.msk.f32.mxu1 %vm363_vm1, %v4571_v5  ;;  %6188 = vst [vmem:[#allocation38_spill] sm:$0xff] %v4886_v16 }
  0x4e   : > { %3893 = vmatmul.mubr.msk.f32.gmra.mxu0 %vm363_vm1, %v4852_v54  ;;  %v989_v54 = vrot.slane %v4373_v23, 2 }
  0x4f   : > { %3895 = vmatprep.mubr.msk.f32.mxu0 %vm363_vm1, %v4858_v60 }
  0x50   : > { %3837 = vmatmul.mubr.msk.f32.gmra.mxu1 %vm363_vm1, %v4574_v24  ;;  %v4892_v7 = vsel %vm942_vm2, %v988_v47, %v989_v54  ;;  %v4903_v30 = vsel %vm942_vm2, %v989_v54, %v991_v13  ;;  %v998_v47 = vrot.slane %v4459_v57, 2  ;;  %v1001_v54 = vrot.slane %v4490_v4, 2 }
  0x51   : > { %3839 = vmatprep.mubr.msk.f32.mxu1 %vm363_vm1, %v4628_v48  ;;  %6189 = vst [vmem:[#allocation39_spill] sm:$0xff] %v4903_v30 }
  0x52   : > { %3896 = vmatmul.mubr.msk.f32.gmra.mxu0 %vm363_vm1, %v4869_v28  ;;  %v994_v28 = vrot.slane %v4417_v41, 2 }
  0x53   : > { %3898 = vmatprep.mubr.msk.f32.mxu0 %vm363_vm1, %v4875_v3 }
  0x54   : > { %3840 = vmatmul.mubr.msk.f32.gmra.mxu1 %vm363_vm1, %v4631_v55  ;;  %v4909_v29 = vsel %vm942_vm2, %v993_v0, %v994_v28  ;;  %v4920_v49 = vsel %vm942_vm2, %v994_v28, %v996_v61  ;;  %v1003_v0 = vrot.slane %v4494_v9, 2  ;;  %v1006_v28 = vrot.slane %v4513_v21, 2 }
  0x55   : > { %3842 = vmatprep.mubr.msk.f32.mxu1 %vm363_vm1, %v4344_v8  ;;  %6190 = vst [vmem:[#allocation40_spill] sm:$0xff] %v4920_v49 }
  0x56   : > { %3899 = vmatmul.mubr.msk.f32.gmra.mxu0 %vm363_vm1, %v4886_v16  ;;  %v999_v16 = vrot.slane %v4462_v58, 2 }
  0x57   : > { %3901 = vmatprep.mubr.msk.f32.mxu0 %vm363_vm1, %v4892_v7 }
  0x58   : > { %3843 = vmatmul.mubr.msk.f32.gmra.mxu1 %vm363_vm1, %v4349_v11  ;;  %v4926_v13 = vsel %vm942_vm2, %v998_v47, %v999_v16  ;;  %v4937_v4 = vsel %vm942_vm2, %v999_v16, %v1001_v54  ;;  %v1008_v47 = vrot.slane %v4532_v34, 2  ;;  %v1011_v16 = vrot.slane %v4563_v62, 2 }
  0x59   : > { %3845 = vmatprep.mubr.msk.f32.mxu1 %vm363_vm1, %v4370_v22  ;;  %6191 = vst [vmem:[#allocation41_spill] sm:$0xff] %v4926_v13  ;;  %6192 = vst [vmem:[#allocation42_spill] sm:$0xff] %v4937_v4 }
  0x5a   : > { %3902 = vmatmul.mubr.msk.f32.gmra.mxu0 %vm363_vm1, %v4903_v30  ;;  %v1004_v30 = vrot.slane %v4497_v10, 2 }
  0x5b   : > { %3904 = vmatprep.mubr.msk.f32.mxu0 %vm363_vm1, %v4909_v29 }
  0x5c   : > { %3846 = vmatmul.mubr.msk.f32.gmra.mxu1 %vm363_vm1, %v4373_v23  ;;  %v4943_v61 = vsel %vm942_vm2, %v1003_v0, %v1004_v30  ;;  %v4954_v21 = vsel %vm942_vm2, %v1004_v30, %v1006_v28  ;;  %v1013_v0 = vrot.slane %v4582_v26, 2  ;;  %v1016_v30 = vrot.slane %v4625_v27, 2 }
  0x5d   : > { %3848 = vmatprep.mubr.msk.f32.mxu1 %vm363_vm1, %v4407_v37  ;;  %6193 = vst [vmem:[#allocation43_spill] sm:$0xff] %v4943_v61  ;;  %6194 = vst [vmem:[#allocation44_spill] sm:$0xff] %v4954_v21 }
  0x5e   : > { %3905 = vmatmul.mubr.msk.f32.gmra.mxu0 %vm363_vm1, %v4920_v49  ;;  %v1009_v49 = vrot.slane %v4535_v39, 2 }
  0x5f   : > { %3907 = vmatprep.mubr.msk.f32.mxu0 %vm363_vm1, %v4926_v13 }
  0x60   : > { %3849 = vmatmul.mubr.msk.f32.gmra.mxu1 %vm363_vm1, %v4417_v41  ;;  %v4960_v54 = vsel %vm942_vm2, %v1008_v47, %v1009_v49  ;;  %v4971_v62 = vsel %vm942_vm2, %v1009_v49, %v1011_v16  ;;  %v1018_v47 = vrot.slane %v4637_v2, 2  ;;  %v1021_v49 = vrot.slane %v4671_v40, 2  ;;  %v6198_v40 = vld [vmem:[#allocation4_spill] sm:$0xff] }
  0x61   : > { %3851 = vmatprep.mubr.msk.f32.mxu1 %vm363_vm1, %v4459_v57 }
  0x62   : > { %3908 = vmatmul.mubr.msk.f32.gmra.mxu0 %vm363_vm1, %v4937_v4  ;;  %v6195_v4 = vld [vmem:[#allocation18_spill] sm:$0xff] }
  0x63   : > { %3910 = vmatprep.mubr.msk.f32.mxu0 %vm363_vm1, %v4943_v61  ;;  %v1014_v13 = vrot.slane %v6195_v4, 2 }
  0x64   : > { %3852 = vmatmul.mubr.msk.f32.gmra.mxu1 %vm363_vm1, %v4462_v58 }
  0x65   : > { %3854 = vmatprep.mubr.msk.f32.mxu1 %vm363_vm1, %v4494_v9  ;;  %v4977_v28 = vsel %vm942_vm2, %v1013_v0, %v1014_v13  ;;  %v4988_v27 = vsel %vm942_vm2, %v1014_v13, %v1016_v30  ;;  %v6199_v0 = vld [vmem:[#allocation6_spill] sm:$0xff]  ;;  %v6200_v30 = vld [vmem:[#allocation8_spill] sm:$0xff] }
  0x66   : > { %3911 = vmatmul.mubr.msk.f32.gmra.mxu0 %vm363_vm1, %v4954_v21  ;;  %v6196_v21 = vld [vmem:[#allocation23_spill] sm:$0xff] }
  0x67   : > { %3913 = vmatprep.mubr.msk.f32.mxu0 %vm363_vm1, %v4960_v54  ;;  %v1019_v61 = vrot.slane %v6196_v21, 2 }
  0x68   : > { %3855 = vmatmul.mubr.msk.f32.gmra.mxu1 %vm363_vm1, %v4497_v10 }
  0x69   : > { %3857 = vmatprep.mubr.msk.f32.mxu1 %vm363_vm1, %v4532_v34  ;;  %v4994_v16 = vsel %vm942_vm2, %v1018_v47, %v1019_v61  ;;  %v5003_v13 = vsel %vm942_vm2, %v1019_v61, %v1021_v49  ;;  %v3284_v61 = vld [vmem:[%s6067_s1 + $0xb0] sm:$0xff]  ;;  %v6201_v47 = vld [vmem:[#allocation10_spill] sm:$0xff] }
  0x6a   : > { %3914 = vmatmul.mubr.msk.f32.gmra.mxu0 %vm363_vm1, %v4971_v62  ;;  %6197 = vst [vmem:[#allocation18_spill] sm:$0xff] %v5003_v13  ;;  %v6203_v49 = vld [vmem:[#allocation14_spill] sm:$0xff] }
  0x6b   : > { %3916 = vmatprep.mubr.msk.f32.mxu0 %vm363_vm1, %v4977_v28 }
  0x6c   : > { %3858 = vmatmul.mubr.msk.f32.gmra.mxu1 %vm363_vm1, %v4535_v39 }
  0x6d   : > { %3860 = vmatprep.mubr.msk.f32.mxu1 %vm363_vm1, %v4582_v26 }
  0x6e   : > { %3917 = vmatmul.mubr.msk.f32.gmra.mxu0 %vm363_vm1, %v4988_v27 }
  0x6f   : > { %3919 = vmatprep.mubr.msk.f32.mxu0 %vm363_vm1, %v4994_v16 }
  0x70   : > { %3861 = vmatmul.mubr.msk.f32.gmra.mxu1 %vm363_vm1, %v6195_v4 }
  0x71   : > { %3863 = vmatprep.mubr.msk.f32.mxu1 %vm363_vm1, %v4637_v2 }
  0x72   : > { %3920 = vmatmul.mubr.msk.f32.gmra.mxu0 %vm363_vm1, %v5003_v13 }
  0x73   : > { %3986 = vmatprep.mubr.msk.f32.mxu0 %vm363_vm1, %v6198_v40  ;;  %v3282_v40 = vld [vmem:[%s6067_s1 + $0xa0] sm:$0xff] }
  0x74   : > { %3864 = vmatmul.mubr.msk.f32.gmra.mxu1 %vm363_vm1, %v6196_v21 }
  0x75   : > { %3930 = vmatprep.mubr.msk.f32.mxu1 %vm363_vm1, %v4361_v17  ;;  %v3320_v17 = vld [vmem:[%s6067_s1 + $0xd0] sm:$0xff] }
  0x76   : > { %3987 = vmatmul.mubr.msk.f32.vlgmr.msra.gmra.mxu0 %vm363_vm1, %v6199_v0  ;;  %v6204_v0 = vld [vmem:[#allocation16_spill] sm:$0xff] }
  0x77   : > { %4091 = vmatpush3.msra.mxu0 %v4817_v18  ;;  %3989 = vmatprep.mubr.msk.f32.mxu0 %vm363_vm1, %v6200_v30  ;;  %v3319_v18 = vld [vmem:[%s6067_s1 + $0xc8] sm:$0xff] }
  0x78   : > { %3931 = vmatmul.mubr.msk.f32.vlgmr.msra.gmra.mxu1 %vm363_vm1, %v4366_v20  ;;  %v3283_v20 = vld [vmem:[%s6067_s1 + $0xa8] sm:$0xff]  ;;  %4092 = vmatprep.subr.mxu0 %v3320_v17 }
  0x79   : > { %4035 = vmatpush3.msra.mxu1 %v4804_v19  ;;  %3933 = vmatprep.mubr.msk.f32.mxu1 %vm363_vm1, %v4401_v35  ;;  %v6202_v19 = vld [vmem:[#allocation12_spill] sm:$0xff] }
  0x7a   : > { %4036 = vmatprep.subr.mxu1 %v3284_v61  ;;  %3990 = vmatmul.mubr.msk.f32.gmra.mxu0 %vm363_vm1, %v6201_v47 }
  0x7b   : > { %4037 = vmatpush3.msra.mxu1 %v3284_v61  ;;  %3992 = vmatprep.mubr.msk.f32.mxu0 %vm363_vm1, %v6202_v19  ;;  %v3318_v61 = vld [vmem:[%s6067_s1 + $0xc0] sm:$0xff] }
  0x7c   : > { %3934 = vmatmul.mubr.msk.f32.gmra.mxu1 %vm363_vm1, %v4404_v36  ;;  %4093 = vmatpush3.msra.mxu0 %v3320_v17  ;;  %v6205_v17 = vld [vmem:[#allocation19_spill] sm:$0xff] }
  0x7d   : > { %3936 = vmatprep.mubr.msk.f32.mxu1 %vm363_vm1, %v4442_v50  ;;  %4038 = vmatprep.subr.mxu1 %v3283_v20 }
  0x7e   : > { %3993 = vmatmul.mubr.msk.f32.gmra.mxu0 %vm363_vm1, %v6203_v49  ;;  %4039 = vmatpush3.msra.mxu1 %v3283_v20  ;;  %v5064_v20 = vld [vmem:[%s6067_s1 + $0xf8] sm:$0xff] }
  0x7f   : > { %3995 = vmatprep.mubr.msk.f32.mxu0 %vm363_vm1, %v6204_v0  ;;  %4094 = vmatprep.subr.mxu0 %v3319_v18  ;;  %v6206_v0 = vld [vmem:[#allocation21_spill] sm:$0xff] }
  0x80   : > { %3937 = vmatmul.mubr.msk.f32.gmra.mxu1 %vm363_vm1, %v4445_v51  ;;  %4095 = vmatpush3.msra.mxu0 %v3319_v18  ;;  %v5073_v18 = vld [vmem:[%s6067_s1 + $0x118] sm:$0xff] }
  0x81   : > { %3939 = vmatprep.mubr.msk.f32.mxu1 %vm363_vm1, %v4465_v59  ;;  %4040 = vmatprep.subr.mxu1 %v3282_v40 }
  0x82   : > { %3996 = vmatmul.mubr.msk.f32.gmra.mxu0 %vm363_vm1, %v6205_v17  ;;  %4041 = vmatpush3.msra.mxu1 %v3282_v40  ;;  %v6207_v40 = vld [vmem:[#allocation24_spill] sm:$0xff] }
  0x83   : > { %3998 = vmatprep.mubr.msk.f32.mxu0 %vm363_vm1, %v6206_v0  ;;  %4096 = vmatprep.subr.mxu0 %v3318_v61  ;;  %v6208_v0 = vld [vmem:[#allocation26_spill] sm:$0xff] }
  0x84   : > { %3940 = vmatmul.mubr.msk.f32.gmra.mxu1 %vm363_vm1, %v4479_v1  ;;  %4097 = vmatpush3.msra.mxu0 %v3318_v61  ;;  %v6209_v61 = vld [vmem:[#allocation2_spill] sm:$0xff] }
  0x85   : > { %3942 = vmatprep.mubr.msk.f32.mxu1 %vm363_vm1, %v4524_v32  ;;  %4146 = vmatprep.subr.mxu1 %v5064_v20 }
  0x86   : > { %3999 = vmatmul.mubr.msk.f32.gmra.mxu0 %vm363_vm1, %v6207_v40  ;;  %4202 = vmatprep.subr.mxu0 %v5073_v18  ;;  %v5160_v40 = vld [vmem:[%s4329_s25 + $0x190] sm:$0x3] }
  0x87   : > { %4001 = vmatprep.mubr.msk.f32.mxu0 %vm363_vm1, %v6208_v0  ;;  %v5147_v0 = vld [vmem:[%s4329_s25 + $0x188] sm:$0xff] }
  0x88   : > { %3943 = vmatmul.mubr.msk.f32.gmra.mxu1 %vm363_vm1, %v4527_v33 }
  0x89   : > { %3945 = vmatprep.mubr.msk.f32.mxu1 %vm363_vm1, %v4571_v5 }
  0x8a   : > { %4002 = vmatmul.mubr.msk.f32.gmra.mxu0 %vm363_vm1, %v4680_v44  ;;  %v6210_v44 = vld [vmem:[#allocation3_spill] sm:$0xff] }
  0x8b   : > { %4004 = vmatprep.mubr.msk.f32.mxu0 %vm363_vm1, %v4690_v12  ;;  %v6211_v12 = vld [vmem:[#allocation5_spill] sm:$0xff] }
  0x8c   : > { %3946 = vmatmul.mubr.msk.f32.gmra.mxu1 %vm363_vm1, %v4574_v24 }
  0x8d   : > { %3948 = vmatprep.mubr.msk.f32.mxu1 %vm363_vm1, %v4628_v48 }
  0x8e   : > { %4005 = vmatmul.mubr.msk.f32.gmra.mxu0 %vm363_vm1, %v4705_v38  ;;  %v6212_v38 = vld [vmem:[#allocation7_spill] sm:$0xff] }
  0x8f   : > { %4007 = vmatprep.mubr.msk.f32.mxu0 %vm363_vm1, %v6209_v61  ;;  %v6213_v61 = vld [vmem:[#allocation9_spill] sm:$0xff] }
  0x90   : > { %3949 = vmatmul.mubr.msk.f32.gmra.mxu1 %vm363_vm1, %v4631_v55 }
  0x91   : > { %3951 = vmatprep.mubr.msk.f32.mxu1 %vm363_vm1, %v4344_v8 }
  0x92   : > { %4008 = vmatmul.mubr.msk.f32.gmra.mxu0 %vm363_vm1, %v6210_v44  ;;  %v6214_v44 = vld [vmem:[#allocation11_spill] sm:$0xff] }
  0x93   : > { %4010 = vmatprep.mubr.msk.f32.mxu0 %vm363_vm1, %v6211_v12  ;;  %v6215_v12 = vld [vmem:[#allocation13_spill] sm:$0xff] }
  0x94   : > { %3952 = vmatmul.mubr.msk.f32.gmra.mxu1 %vm363_vm1, %v4349_v11 }
  0x95   : > { %3954 = vmatprep.mubr.msk.f32.mxu1 %vm363_vm1, %v4370_v22 }
  0x96   : > { %4011 = vmatmul.mubr.msk.f32.gmra.mxu0 %vm363_vm1, %v6212_v38  ;;  %v6216_v38 = vld [vmem:[#allocation15_spill] sm:$0xff] }
  0x97   : > { %4013 = vmatprep.mubr.msk.f32.mxu0 %vm363_vm1, %v6213_v61  ;;  %v6217_v61 = vld [vmem:[#allocation17_spill] sm:$0xff] }
  0x98   : > { %3955 = vmatmul.mubr.msk.f32.gmra.mxu1 %vm363_vm1, %v4373_v23 }
  0x99   : > { %3957 = vmatprep.mubr.msk.f32.mxu1 %vm363_vm1, %v4407_v37 }
  0x9a   : > { %4014 = vmatmul.mubr.msk.f32.gmra.mxu0 %vm363_vm1, %v6214_v44  ;;  %v6218_v44 = vld [vmem:[#allocation20_spill] sm:$0xff] }
  0x9b   : > { %4016 = vmatprep.mubr.msk.f32.mxu0 %vm363_vm1, %v6215_v12  ;;  %v6219_v12 = vld [vmem:[#allocation22_spill] sm:$0xff] }
  0x9c   : > { %3958 = vmatmul.mubr.msk.f32.gmra.mxu1 %vm363_vm1, %v4417_v41 }
  0x9d   : > { %3960 = vmatprep.mubr.msk.f32.mxu1 %vm363_vm1, %v4459_v57 }
  0x9e   : > { %4017 = vmatmul.mubr.msk.f32.gmra.mxu0 %vm363_vm1, %v6216_v38  ;;  %v5144_v38 = vld [vmem:[%s4329_s25 + $0x180] sm:$0xff] }
  0x9f   : > { %4019 = vmatprep.mubr.msk.f32.mxu0 %vm363_vm1, %v6217_v61  ;;  %v6220_v61 = vld [vmem:[#allocation25_spill] sm:$0xff] }
  0xa0   : > { %3961 = vmatmul.mubr.msk.f32.gmra.mxu1 %vm363_vm1, %v4462_v58 }
  0xa1   : > { %3963 = vmatprep.mubr.msk.f32.mxu1 %vm363_vm1, %v4494_v9 }
  0xa2   : > { %4020 = vmatmul.mubr.msk.f32.gmra.mxu0 %vm363_vm1, %v6218_v44  ;;  %v1619_v44 = vrot.slane %v5147_v0, 1 }
  0xa3   : > { %4022 = vmatprep.mubr.msk.f32.mxu0 %vm363_vm1, %v6219_v12  ;;  %v1618_v12 = vrot.slane %v5144_v38, 1 }
  0xa4   : > { %3964 = vmatmul.mubr.msk.f32.gmra.mxu1 %vm363_vm1, %v4497_v10 }
  0xa5   : > { %3966 = vmatprep.mubr.msk.f32.mxu1 %vm363_vm1, %v4532_v34 }
  0xa6   : > { %4023 = vmatmul.mubr.msk.f32.gmra.mxu0 %vm363_vm1, %v6220_v61  ;;  %v5172_v61 = vsel %vm277_vm0, %v1618_v12, %v1619_v44  ;;  %v3356_v12 = vld [vmem:[%s6067_s1 + $0xf0] sm:$0xff] }
  0xa7   : > { %4025 = vmatprep.mubr.msk.f32.mxu0 %vm363_vm1, %v4666_v45  ;;  %v1621_v45 = vrot.slane %v5160_v40, 1  ;;  %6221 = vst [vmem:[#allocation23_spill] sm:$0xff] %v5172_v61 }
  0xa8   : > { %3967 = vmatmul.mubr.msk.f32.gmra.mxu1 %vm363_vm1, %v4535_v39 }
  0xa9   : > { %3969 = vmatprep.mubr.msk.f32.mxu1 %vm363_vm1, %v4582_v26 }
  0xaa   : > { %4026 = vmatmul.mubr.msk.f32.gmra.mxu0 %vm363_vm1, %v4687_v63  ;;  %v5181_v63 = vsel %vm277_vm0, %v1619_v44, %v1621_v45  ;;  %v6230_v45 = vld [vmem:[#allocation41_spill] sm:$0xff] }
  0xab   : > { %4028 = vmatprep.mubr.msk.f32.mxu0 %vm363_vm1, %v4695_v25  ;;  %6222 = vst [vmem:[#allocation4_spill] sm:$0xff] %v5181_v63 }
  0xac   : > { %3970 = vmatmul.mubr.msk.f32.gmra.mxu1 %vm363_vm1, %v6195_v4 }
  0xad   : > { %3972 = vmatprep.mubr.msk.f32.mxu1 %vm363_vm1, %v4637_v2 }
  0xae   : > { %4029 = vmatmul.mubr.msk.f32.gmra.mxu0 %vm363_vm1, %v4710_v14  ;;  %v5374_v14 = vld [vmem:[%s4329_s25 + $0x198] sm:$0xff] }
  0xaf   : > { %4031 = vmatprep.mubr.msk.f32.mxu0 %vm363_vm1, %v5172_v61 }
  0xb0   : > { %3973 = vmatmul.mubr.msk.f32.gmra.mxu1 %vm363_vm1, %v6196_v21 }
  0xb1   : > { %3975 = vmatprep.mubr.msk.f32.mxu1 %vm363_vm1, %v5144_v38 }
  0xb2   : > { %4032 = vmatmul.mubr.msk.f32.gmra.mxu0 %vm363_vm1, %v5181_v63 }
  0xb3   : > { %4098 = vmatprep.mubr.msk.f32.mxu0 %vm363_vm1, %v4401_v35  ;;  %v3392_v35 = vld [vmem:[%s6067_s1 + $0x110] sm:$0xff] }
  0xb4   : > { %3976 = vmatmul.mubr.msk.f32.gmra.mxu1 %vm363_vm1, %v5147_v0 }
  0xb5   : > { %4042 = vmatprep.mubr.msk.f32.mxu1 %vm363_vm1, %v4728_v15 }
  0xb6   : > { %4099 = vmatmul.mubr.msk.f32.vlgmr.msra.gmra.mxu0 %vm363_vm1, %v4404_v36  ;;  %v3355_v36 = vld [vmem:[%s6067_s1 + $0xe8] sm:$0xff] }
  0xb7   : > { %4203 = vmatpush3.msra.mxu0 %v5073_v18  ;;  %4101 = vmatprep.mubr.msk.f32.mxu0 %vm363_vm1, %v4442_v50  ;;  %v3391_v50 = vld [vmem:[%s6067_s1 + $0x108] sm:$0xff] }
  0xb8   : > { %4043 = vmatmul.mubr.msk.f32.vlgmr.msra.gmra.mxu1 %vm363_vm1, %v4737_v6  ;;  %4204 = vmatprep.subr.mxu0 %v3392_v35  ;;  %v6231_v6 = vld [vmem:[#allocation42_spill] sm:$0xff] }
  0xb9   : > { %4147 = vmatpush3.msra.mxu1 %v5064_v20  ;;  %4045 = vmatprep.mubr.msk.f32.mxu1 %vm363_vm1, %v4744_v46  ;;  %v6232_v20 = vld [vmem:[#allocation43_spill] sm:$0xff] }
  0xba   : > { %4148 = vmatprep.subr.mxu1 %v3356_v12  ;;  %4102 = vmatmul.mubr.msk.f32.gmra.mxu0 %vm363_vm1, %v4445_v51  ;;  %v3354_v51 = vld [vmem:[%s6067_s1 + $0xe0] sm:$0xff] }
  0xbb   : > { %4149 = vmatpush3.msra.mxu1 %v3356_v12  ;;  %4104 = vmatprep.mubr.msk.f32.mxu0 %vm363_vm1, %v4465_v59  ;;  %v6223_v59 = vld [vmem:[#allocation34_spill] sm:$0xff] }
  0xbc   : > { %4046 = vmatmul.mubr.msk.f32.gmra.mxu1 %vm363_vm1, %v4763_v43  ;;  %4205 = vmatpush3.msra.mxu0 %v3392_v35  ;;  %v6233_v35 = vld [vmem:[#allocation44_spill] sm:$0xff] }
  0xbd   : > { %4048 = vmatprep.mubr.msk.f32.mxu1 %vm363_vm1, %v4769_v56  ;;  %4150 = vmatprep.subr.mxu1 %v3355_v36 }
  0xbe   : > { %4105 = vmatmul.mubr.msk.f32.gmra.mxu0 %vm363_vm1, %v4479_v1  ;;  %4151 = vmatpush3.msra.mxu1 %v3355_v36  ;;  %v3390_v1 = vld [vmem:[%s6067_s1 + $0x100] sm:$0xff] }
  0xbf   : > { %4107 = vmatprep.mubr.msk.f32.mxu0 %vm363_vm1, %v4524_v32  ;;  %4206 = vmatprep.subr.mxu0 %v3391_v50  ;;  %v6224_v32 = vld [vmem:[#allocation35_spill] sm:$0xff] }
  0xc0   : > { %4049 = vmatmul.mubr.msk.f32.gmra.mxu1 %vm363_vm1, %v4786_v42  ;;  %4207 = vmatpush3.msra.mxu0 %v3391_v50 }
  0xc1   : > { %4051 = vmatprep.mubr.msk.f32.mxu1 %vm363_vm1, %v6223_v59  ;;  %4152 = vmatprep.subr.mxu1 %v3354_v51 }
  0xc2   : > { %4108 = vmatmul.mubr.msk.f32.gmra.mxu0 %vm363_vm1, %v4527_v33  ;;  %4153 = vmatpush3.msra.mxu1 %v3354_v51  ;;  %v6225_v33 = vld [vmem:[#allocation36_spill] sm:$0xff]  ;;  %v1889_v51 = vrot.slane %v5144_v38, 2 }
  0xc3   : > { %4110 = vmatprep.mubr.msk.f32.mxu0 %vm363_vm1, %v4571_v5  ;;  %4208 = vmatprep.subr.mxu0 %v3390_v1  ;;  %v6227_v5 = vld [vmem:[#allocation38_spill] sm:$0xff] }
  0xc4   : > { %4052 = vmatmul.mubr.msk.f32.gmra.mxu1 %vm363_vm1, %v4811_v31  ;;  %4209 = vmatpush3.msra.mxu0 %v3390_v1 }
  0xc5   : > { %4054 = vmatprep.mubr.msk.f32.mxu1 %vm363_vm1, %v4822_v53 }
  0xc6   : > { %4111 = vmatmul.mubr.msk.f32.gmra.mxu0 %vm363_vm1, %v4574_v24  ;;  %v6226_v24 = vld [vmem:[#allocation37_spill] sm:$0xff] }
  0xc7   : > { %4113 = vmatprep.mubr.msk.f32.mxu0 %vm363_vm1, %v4628_v48 }
  0xc8   : > { %4055 = vmatmul.mubr.msk.f32.gmra.mxu1 %vm363_vm1, %v6224_v32 }
  0xc9   : > { %4057 = vmatprep.mubr.msk.f32.mxu1 %vm363_vm1, %v4841_v52 }
  0xca   : > { %4114 = vmatmul.mubr.msk.f32.gmra.mxu0 %vm363_vm1, %v4631_v55  ;;  %v6229_v55 = vld [vmem:[#allocation40_spill] sm:$0xff] }
  0xcb   : > { %4116 = vmatprep.mubr.msk.f32.mxu0 %vm363_vm1, %v4344_v8 }
  0xcc   : > { %4058 = vmatmul.mubr.msk.f32.gmra.mxu1 %vm363_vm1, %v6225_v33 }
  0xcd   : > { %4060 = vmatprep.mubr.msk.f32.mxu1 %vm363_vm1, %v4858_v60 }
  0xce   : > { %4117 = vmatmul.mubr.msk.f32.gmra.mxu0 %vm363_vm1, %v4349_v11 }
  0xcf   : > { %4119 = vmatprep.mubr.msk.f32.mxu0 %vm363_vm1, %v4370_v22  ;;  %v6228_v22 = vld [vmem:[#allocation39_spill] sm:$0xff] }
  0xd0   : > { %4061 = vmatmul.mubr.msk.f32.gmra.mxu1 %vm363_vm1, %v6226_v24 }
  0xd1   : > { %4063 = vmatprep.mubr.msk.f32.mxu1 %vm363_vm1, %v4875_v3 }
  0xd2   : > { %4120 = vmatmul.mubr.msk.f32.gmra.mxu0 %vm363_vm1, %v4373_v23 }
  0xd3   : > { %4122 = vmatprep.mubr.msk.f32.mxu0 %vm363_vm1, %v4407_v37 }
  0xd4   : > { %4064 = vmatmul.mubr.msk.f32.gmra.mxu1 %vm363_vm1, %v6227_v5 }
  0xd5   : > { %4066 = vmatprep.mubr.msk.f32.mxu1 %vm363_vm1, %v4892_v7 }
  0xd6   : > { %v5277_v8 = vpop.f32.mrf.mxu0  ;;  %4123 = vmatmul.mubr.msk.f32.gmra.mxu0 %vm363_vm1, %v4417_v41 }
  0xd7   : > { %v5281_v11 = vpop.f32.mrf.mxu1  ;;  %4125 = vmatprep.mubr.msk.f32.mxu0 %vm363_vm1, %v4459_v57 }
  0xd8   : > { %4067 = vmatmul.mubr.msk.f32.gmra.mxu1 %vm363_vm1, %v6228_v22  ;;  %v5287_v23 = vpop.f32.mrf.mxu0 }
  0xd9   : > { %4069 = vmatprep.mubr.msk.f32.mxu1 %vm363_vm1, %v4909_v29  ;;  %v5291_v37 = vpop.f32.mrf.mxu1 }
  0xda   : > { %v5293_v48 = vpop.f32.mrf.mxu0  ;;  %4126 = vmatmul.mubr.msk.f32.gmra.mxu0 %vm363_vm1, %v4462_v58 }
  0xdb   : > { %v5297_v41 = vpop.f32.mrf.mxu1  ;;  %4128 = vmatprep.mubr.msk.f32.mxu0 %vm363_vm1, %v4494_v9 }
  0xdc   : > { %4070 = vmatmul.mubr.msk.f32.gmra.mxu1 %vm363_vm1, %v6229_v55  ;;  %v5303_v57 = vpop.f32.mrf.mxu0 }
  0xdd   : > { %4072 = vmatprep.mubr.msk.f32.mxu1 %vm363_vm1, %v6230_v45  ;;  %v5307_v44 = vpop.f32.mrf.mxu1 }
  0xde   : > { %v5309_v15 = vpop.f32.mrf.mxu0  ;;  %4129 = vmatmul.mubr.msk.f32.gmra.mxu0 %vm363_vm1, %v4497_v10 }
  0xdf   : > { %v5313_v58 = vpop.f32.mrf.mxu1  ;;  %4131 = vmatprep.mubr.msk.f32.mxu0 %vm363_vm1, %v4532_v34 }
  0xe0   : > { %4073 = vmatmul.mubr.msk.f32.gmra.mxu1 %vm363_vm1, %v6231_v6  ;;  %v5319_v9 = vpop.f32.mrf.mxu0 }
  0xe1   : > { %4075 = vmatprep.mubr.msk.f32.mxu1 %vm363_vm1, %v6232_v20  ;;  %v5323_v18 = vpop.f32.mrf.mxu1 }
  0xe2   : > { %v5325_v12 = vpop.f32.mrf.mxu0  ;;  %4132 = vmatmul.mubr.msk.f32.gmra.mxu0 %vm363_vm1, %v4535_v39 }
  0xe3   : > { %4134 = vmatprep.mubr.msk.f32.mxu0 %vm363_vm1, %v4582_v26 }
  0xe4   : > { %v5329_v10 = vpop.f32.mrf.mxu1  ;;  %4076 = vmatmul.mubr.msk.f32.gmra.mxu1 %vm363_vm1, %v6233_v35  ;;  %v5335_v34 = vpop.f32.mrf.mxu0 }
  0xe5   : > { %4078 = vmatprep.mubr.msk.f32.mxu1 %vm363_vm1, %v4960_v54 }
  0xe6   : > { %v5339_v36 = vpop.f32.mrf.mxu1  ;;  %v5341_v50 = vpop.f32.mrf.mxu0  ;;  %4135 = vmatmul.mubr.msk.f32.gmra.mxu0 %vm363_vm1, %v6195_v4  ;;  %v1890_v4 = vrot.slane %v5147_v0, 2 }
  0xe7   : > { %4137 = vmatprep.mubr.msk.f32.mxu0 %vm363_vm1, %v4637_v2 }
  0xe8   : > { %v5345_v39 = vpop.f32.mrf.mxu1  ;;  %4079 = vmatmul.mubr.msk.f32.gmra.mxu1 %vm363_vm1, %v4971_v62  ;;  %v5351_v26 = vpop.f32.mrf.mxu0 }
  0xe9   : > { %6234 = vst [vmem:[#allocation6_spill] sm:$0xff] %v5345_v39  ;;  %4081 = vmatprep.mubr.msk.f32.mxu1 %vm363_vm1, %v4977_v28  ;;  %v5393_v39 = vld [vmem:[%s4329_s25 + $0x1a0] sm:$0xff] }
  0xea   : > { %v5356_v1 = vpop.f32.mrf.mxu1  ;;  %v5359_v63 = vpop.f32.mrf.mxu0  ;;  %4138 = vmatmul.mubr.msk.f32.gmra.mxu0 %vm363_vm1, %v6196_v21  ;;  %v5380_v21 = vsel %vm942_vm2, %v1889_v51, %v1890_v4 }
  0xeb   : > { %6235 = vst [vmem:[#allocation8_spill] sm:$0xff] %v5356_v1  ;;  %4140 = vmatprep.mubr.msk.f32.mxu0 %vm363_vm1, %v5144_v38  ;;  %v1892_v1 = vrot.slane %v5160_v40, 2  ;;  %6238 = vst [vmem:[#allocation14_spill] sm:$0xff] %v5380_v21 }
  0xec   : > { %v5363_v61 = vpop.f32.mrf.mxu1  ;;  %4082 = vmatmul.mubr.msk.f32.gmra.mxu1 %vm363_vm1, %v4988_v27  ;;  %v5369_v2 = vpop.f32.mrf.mxu0 }
  0xed   : > { %6236 = vst [vmem:[#allocation10_spill] sm:$0xff] %v5363_v61  ;;  %4084 = vmatprep.mubr.msk.f32.mxu1 %vm363_vm1, %v4994_v16  ;;  %v5400_v51 = vsel %vm942_vm2, %v1890_v4, %v1892_v1 }
  0xee   : > { %v5377_v25 = vpop.f32.mrf.mxu1  ;;  %v5382_v61 = vpop.f32.mrf.mxu0  ;;  %4141 = vmatmul.mubr.msk.f32.gmra.mxu0 %vm363_vm1, %v5147_v0  ;;  %6240 = vst [vmem:[#allocation34_spill] sm:$0xff] %v5400_v51 }
  0xef   : > { %6237 = vst [vmem:[#allocation12_spill] sm:$0xff] %v5377_v25  ;;  %4143 = vmatprep.mubr.msk.f32.mxu0 %vm363_vm1, %v5374_v14 }
  0xf0   : > { %v5386_v38 = vpop.f32.mrf.mxu1  ;;  %4085 = vmatmul.mubr.msk.f32.gmra.mxu1 %vm363_vm1, %v5003_v13  ;;  %v5395_v40 = vpop.f32.mrf.mxu0 }
  0xf1   : > { %6239 = vst [vmem:[#allocation19_spill] sm:$0xff] %v5386_v38  ;;  %4087 = vmatprep.mubr.msk.f32.mxu1 %vm363_vm1, %v5380_v21 }
  0xf2   : > { %v5402_v25 = vpop.f32.mrf.mxu1  ;;  %v5404_v0 = vpop.f32.mrf.mxu0  ;;  %4144 = vmatmul.mubr.msk.f32.gmra.mxu0 %vm363_vm1, %v5393_v39 }
  0xf3   : > { %6241 = vst [vmem:[#allocation35_spill] sm:$0xff] %v5402_v25  ;;  %4210 = vmatprep.mubr.msk.f32.mxu0 %vm363_vm1, %v4744_v46 }
  0xf4   : > { %v5408_v38 = vpop.f32.mrf.mxu1  ;;  %4088 = vmatmul.mubr.msk.f32.gmra.mxu1 %vm363_vm1, %v5400_v51  ;;  %v5414_v13 = vpop.f32.mrf.mxu0 }
  0xf5   : > { %6242 = vst [vmem:[#allocation36_spill] sm:$0xff] %v5408_v38  ;;  %4154 = vmatprep.mubr.msk.f32.mxu1 %vm363_vm1, %v6200_v30 }
  0xf6   : > { %v5418_v1 = vpop.f32.mrf.mxu1  ;;  %v3876_v4 = vpop.f32.mrf.mxu0  ;;  %4211 = vmatmul.mubr.msk.f32.vlgmr.msra.gmra.mxu0 %vm363_vm1, %v4763_v43 }
  0xf7   : > { %6243 = vst [vmem:[#allocation37_spill] sm:$0xff] %v5418_v1  ;;  %4213 = vmatprep.mubr.msk.f32.mxu0 %vm363_vm1, %v4769_v56 }
  0xf8   : > { %v3820_v25 = vpop.f32.mrf.mxu1  ;;  %4155 = vmatmul.mubr.msk.f32.vlgmr.msra.gmra.mxu1 %vm363_vm1, %v6201_v47  ;;  %v1158_v38 = vpop.f32.mrf.mxu0 }
  0xf9   : > { %v789_v46 = vadd.f32 %v3820_v25, %v5277_v8  ;;  %4157 = vmatprep.mubr.msk.f32.mxu1 %vm363_vm1, %v6202_v19  ;;  %v6244_v19 = vld [vmem:[#allocation16_spill] sm:$0xff] }
  0xfa   : > { %v783_v30 = vpop.f32.mrf.mxu1  ;;  %v3879_v21 = vpop.f32.mrf.mxu0  ;;  %4214 = vmatmul.mubr.msk.f32.gmra.mxu0 %vm363_vm1, %v4786_v42 }
  0xfb   : > { %v5429_v51 = vadd.f32 %v3876_v4, %v789_v46  ;;  %v784_v1 = vadd.f32 %v783_v30, %v5287_v23  ;;  %4216 = vmatprep.mubr.msk.f32.mxu0 %vm363_vm1, %v6223_v59  ;;  %v6246_v30 = vld [vmem:[#allocation24_spill] sm:$0xff] }
  0xfc   : > { %v3823_v43 = vpop.f32.mrf.mxu1  ;;  %4158 = vmatmul.mubr.msk.f32.gmra.mxu1 %vm363_vm1, %v6203_v49  ;;  %v1168_v47 = vpop.f32.mrf.mxu0 }
  0xfd   : > { %v5438_v25 = vadd.f32 %v1158_v38, %v784_v1  ;;  %v799_v56 = vadd.f32 %v3823_v43, %v5293_v48  ;;  %4160 = vmatprep.mubr.msk.f32.mxu1 %vm363_vm1, %v6244_v19 }
  0xfe   : > { %v793_v8 = vpop.f32.mrf.mxu1  ;;  %v3882_v4 = vpop.f32.mrf.mxu0  ;;  %4217 = vmatmul.mubr.msk.f32.gmra.mxu0 %vm363_vm1, %v4811_v31 }
  0xff   : > { %v5443_v23 = vadd.f32 %v3879_v21, %v799_v56  ;;  %v794_v42 = vadd.f32 %v793_v8, %v5303_v57  ;;  %4219 = vmatprep.mubr.msk.f32.mxu0 %vm363_vm1, %v4822_v53  ;;  %v6245_v21 = vld [vmem:[#allocation21_spill] sm:$0xff]  ;;  %v6247_v56 = vld [vmem:[#allocation26_spill] sm:$0xff] }
 0x100   : > { %v3826_v49 = vpop.f32.mrf.mxu1  ;;  %4161 = vmatmul.mubr.msk.f32.gmra.mxu1 %vm363_vm1, %v6205_v17  ;;  %v1178_v38 = vpop.f32.mrf.mxu0 }
 0x101   : > { %v5452_v59 = vadd.f32 %v1168_v47, %v794_v42  ;;  %v809_v48 = vadd.f32 %v3826_v49, %v5309_v15  ;;  %4163 = vmatprep.mubr.msk.f32.mxu1 %vm363_vm1, %v6245_v21  ;;  %v6248_v42 = vld [vmem:[#allocation28_spill] sm:$0xff]  ;;  %v6249_v49 = vld [vmem:[#allocation30_spill] sm:$0xff] }
 0x102   : > { %v803_v57 = vpop.f32.mrf.mxu1  ;;  %v3885_v46 = vpop.f32.mrf.mxu0  ;;  %4220 = vmatmul.mubr.msk.f32.gmra.mxu0 %vm363_vm1, %v6224_v32 }
 0x103   : > { %v5457_v1 = vadd.f32 %v3882_v4, %v809_v48  ;;  %v804_v31 = vadd.f32 %v803_v57, %v5319_v9  ;;  %4222 = vmatprep.mubr.msk.f32.mxu0 %vm363_vm1, %v4841_v52  ;;  %v6250_v57 = vld [vmem:[#allocation32_spill] sm:$0xff] }
 0x104   : > { %v3829_v17 = vpop.f32.mrf.mxu1  ;;  %4164 = vmatmul.mubr.msk.f32.gmra.mxu1 %vm363_vm1, %v6246_v30  ;;  %v1188_v43 = vpop.f32.mrf.mxu0 }
 0x105   : > { %v5466_v53 = vadd.f32 %v1178_v38, %v804_v31  ;;  %v819_v15 = vadd.f32 %v3829_v17, %v5325_v12  ;;  %4166 = vmatprep.mubr.msk.f32.mxu1 %vm363_vm1, %v6247_v56 }
 0x106   : > { %v813_v9 = vpop.f32.mrf.mxu1  ;;  %v3888_v19 = vpop.f32.mrf.mxu0  ;;  %4223 = vmatmul.mubr.msk.f32.gmra.mxu0 %vm363_vm1, %v6225_v33 }
 0x107   : > { %v5471_v47 = vadd.f32 %v3885_v46, %v819_v15  ;;  %v814_v32 = vadd.f32 %v813_v9, %v5335_v34  ;;  %4225 = vmatprep.mubr.msk.f32.mxu0 %vm363_vm1, %v4858_v60  ;;  %v6251_v46 = vld [vmem:[#allocation2_spill] sm:$0xff]  ;;  %v6253_v9 = vld [vmem:[#allocation5_spill] sm:$0xff] }
 0x108   : > { %v3832_v8 = vpop.f32.mrf.mxu1  ;;  %4167 = vmatmul.mubr.msk.f32.gmra.mxu1 %vm363_vm1, %v6248_v42  ;;  %v1198_v4 = vpop.f32.mrf.mxu0  ;;  %v6254_v42 = vld [vmem:[#allocation7_spill] sm:$0xff] }
 0x109   : > { %v5480_v52 = vadd.f32 %v1188_v43, %v814_v32  ;;  %v829_v12 = vadd.f32 %v3832_v8, %v5341_v50  ;;  %4169 = vmatprep.mubr.msk.f32.mxu1 %vm363_vm1, %v6249_v49  ;;  %v6252_v43 = vld [vmem:[#allocation3_spill] sm:$0xff] }
 0x10a   : > { %v823_v34 = vpop.f32.mrf.mxu1  ;;  %v3891_v38 = vpop.f32.mrf.mxu0  ;;  %4226 = vmatmul.mubr.msk.f32.gmra.mxu0 %vm363_vm1, %v6226_v24 }
 0x10b   : > { %v5485_v48 = vadd.f32 %v3888_v19, %v829_v12  ;;  %v824_v33 = vadd.f32 %v823_v34, %v5351_v26  ;;  %4228 = vmatprep.mubr.msk.f32.mxu0 %vm363_vm1, %v4875_v3 }
 0x10c   : > { %v3835_v21 = vpop.f32.mrf.mxu1  ;;  %4170 = vmatmul.mubr.msk.f32.gmra.mxu1 %vm363_vm1, %v6250_v57  ;;  %v1208_v31 = vpop.f32.mrf.mxu0  ;;  %v6257_v57 = vld [vmem:[#allocation13_spill] sm:$0xff] }
 0x10d   : > { %v5494_v60 = vadd.f32 %v1198_v4, %v824_v33  ;;  %v839_v50 = vadd.f32 %v3835_v21, %v5359_v63  ;;  %4172 = vmatprep.mubr.msk.f32.mxu1 %vm363_vm1, %v6251_v46  ;;  %v6255_v4 = vld [vmem:[#allocation9_spill] sm:$0xff] }
 0x10e   : > { %v833_v26 = vpop.f32.mrf.mxu1  ;;  %v3894_v30 = vpop.f32.mrf.mxu0  ;;  %4229 = vmatmul.mubr.msk.f32.gmra.mxu0 %vm363_vm1, %v6227_v5 }
 0x10f   : > { %v5499_v17 = vadd.f32 %v3891_v38, %v839_v50  ;;  %v834_v24 = vadd.f32 %v833_v26, %v5369_v2  ;;  %4231 = vmatprep.mubr.msk.f32.mxu0 %vm363_vm1, %v4892_v7  ;;  %v6256_v38 = vld [vmem:[#allocation11_spill] sm:$0xff] }
 0x110   : > { %v3838_v15 = vpop.f32.mrf.mxu1  ;;  %4173 = vmatmul.mubr.msk.f32.gmra.mxu1 %vm363_vm1, %v6252_v43  ;;  %v1218_v56 = vpop.f32.mrf.mxu0  ;;  %v6258_v26 = vld [vmem:[#allocation15_spill] sm:$0xff] }
 0x111   : > { %v5508_v63 = vadd.f32 %v1208_v31, %v834_v24  ;;  %v849_v3 = vadd.f32 %v3838_v15, %v5382_v61  ;;  %4175 = vmatprep.mubr.msk.f32.mxu1 %vm363_vm1, %v6253_v9 }
 0x112   : > { %v843_v2 = vpop.f32.mrf.mxu1  ;;  %v3897_v19 = vpop.f32.mrf.mxu0  ;;  %4232 = vmatmul.mubr.msk.f32.gmra.mxu0 %vm363_vm1, %v6228_v22 }
 0x113   : > { %v5513_v32 = vadd.f32 %v3894_v30, %v849_v3  ;;  %v844_v5 = vadd.f32 %v843_v2, %v5395_v40  ;;  %4234 = vmatprep.mubr.msk.f32.mxu0 %vm363_vm1, %v4909_v29  ;;  %v6259_v30 = vld [vmem:[#allocation17_spill] sm:$0xff]  ;;  %v6261_v2 = vld [vmem:[#allocation22_spill] sm:$0xff] }
 0x114   : > { %v3841_v8 = vpop.f32.mrf.mxu1  ;;  %4176 = vmatmul.mubr.msk.f32.gmra.mxu1 %vm363_vm1, %v6254_v42  ;;  %v1228_v12 = vpop.f32.mrf.mxu0  ;;  %v6262_v42 = vld [vmem:[#allocation25_spill] sm:$0xff] }
 0x115   : > { %v5522_v7 = vadd.f32 %v1218_v56, %v844_v5  ;;  %v859_v61 = vadd.f32 %v3841_v8, %v5404_v0  ;;  %4178 = vmatprep.mubr.msk.f32.mxu1 %vm363_vm1, %v6255_v4  ;;  %v6260_v56 = vld [vmem:[#allocation20_spill] sm:$0xff] }
 0x116   : > { %v853_v40 = vpop.f32.mrf.mxu1  ;;  %v3900_v34 = vpop.f32.mrf.mxu0  ;;  %4235 = vmatmul.mubr.msk.f32.gmra.mxu0 %vm363_vm1, %v6229_v55 }
 0x117   : > { %v5527_v49 = vadd.f32 %v3897_v19, %v859_v61  ;;  %v854_v22 = vadd.f32 %v853_v40, %v5414_v13  ;;  %4237 = vmatprep.mubr.msk.f32.mxu0 %vm363_vm1, %v6230_v45 }
 0x118   : > { %v3844_v33 = vpop.f32.mrf.mxu1  ;;  %4179 = vmatmul.mubr.msk.f32.gmra.mxu1 %vm363_vm1, %v6256_v38  ;;  %v1238_v21 = vpop.f32.mrf.mxu0  ;;  %v6265_v38 = vld [vmem:[#allocation6_spill] sm:$0xff] }
 0x119   : > { %v5536_v29 = vadd.f32 %v1228_v12, %v854_v22  ;;  %v869_v0 = vadd.f32 %v3844_v33, %v5281_v11  ;;  %4181 = vmatprep.mubr.msk.f32.mxu1 %vm363_vm1, %v6257_v57  ;;  %v6263_v12 = vld [vmem:[#allocation27_spill] sm:$0xff]  ;;  %v2429_v57 = vrot.slane %v5374_v14, 1 }
 0x11a   : > { %v863_v13 = vpop.f32.mrf.mxu1  ;;  %v3903_v31 = vpop.f32.mrf.mxu0  ;;  %4238 = vmatmul.mubr.msk.f32.gmra.mxu0 %vm363_vm1, %v6231_v6 }
 0x11b   : > { %v5541_v50 = vadd.f32 %v3900_v34, %v869_v0  ;;  %v864_v55 = vadd.f32 %v863_v13, %v5291_v37  ;;  %4240 = vmatprep.mubr.msk.f32.mxu0 %vm363_vm1, %v6232_v20  ;;  %v2701_v34 = vrot.slane %v5393_v39, 2  ;;  %v2430_v13 = vrot.slane %v5393_v39, 1  ;;  %v6271_v39 = vld [vmem:[#allocation10_spill] sm:$0xff] }
 0x11c   : > { %v3847_v46 = vpop.f32.mrf.mxu1  ;;  %4182 = vmatmul.mubr.msk.f32.gmra.mxu1 %vm363_vm1, %v6258_v26  ;;  %v1248_v24 = vpop.f32.mrf.mxu0 }
 0x11d   : > { %v5550_v11 = vadd.f32 %v1238_v21, %v864_v55  ;;  %v879_v45 = vadd.f32 %v3847_v46, %v5297_v41  ;;  %4184 = vmatprep.mubr.msk.f32.mxu1 %vm363_vm1, %v6259_v30  ;;  %v6266_v21 = vld [vmem:[#allocation31_spill] sm:$0xff]  ;;  %v6269_v30 = vld [vmem:[#allocation33_spill] sm:$0xff] }
 0x11e   : > { %v873_v37 = vpop.f32.mrf.mxu1  ;;  %v3906_v43 = vpop.f32.mrf.mxu0  ;;  %4241 = vmatmul.mubr.msk.f32.gmra.mxu0 %vm363_vm1, %v6233_v35 }
 0x11f   : > { %v5555_v15 = vadd.f32 %v3903_v31, %v879_v45  ;;  %v874_v6 = vadd.f32 %v873_v37, %v5307_v44  ;;  %4243 = vmatprep.mubr.msk.f32.mxu0 %vm363_vm1, %v4960_v54  ;;  %v6268_v45 = vld [vmem:[#allocation18_spill] sm:$0xff] }
 0x120   : > { %v3850_v3 = vpop.f32.mrf.mxu1  ;;  %4185 = vmatmul.mubr.msk.f32.gmra.mxu1 %vm363_vm1, %v6260_v56  ;;  %v1258_v9 = vpop.f32.mrf.mxu0  ;;  %v6270_v37 = vld [vmem:[#allocation14_spill] sm:$0xff]  ;;  %v6272_v56 = vld [vmem:[#allocation23_spill] sm:$0xff] }
 0x121   : > { %v5564_v41 = vadd.f32 %v1248_v24, %v874_v6  ;;  %v889_v20 = vadd.f32 %v3850_v3, %v5313_v58  ;;  %4187 = vmatprep.mubr.msk.f32.mxu1 %vm363_vm1, %v6261_v2 }
 0x122   : > { %v883_v44 = vpop.f32.mrf.mxu1  ;;  %v3909_v19 = vpop.f32.mrf.mxu0  ;;  %4244 = vmatmul.mubr.msk.f32.gmra.mxu0 %vm363_vm1, %v4971_v62 }
 0x123   : > { %v5569_v5 = vadd.f32 %v3906_v43, %v889_v20  ;;  %v884_v35 = vadd.f32 %v883_v44, %v5323_v18  ;;  %4246 = vmatprep.mubr.msk.f32.mxu0 %vm363_vm1, %v4977_v28  ;;  %v6264_v28 = vld [vmem:[#allocation29_spill] sm:$0xff]  ;;  %v2431_v44 = vsel %vm277_vm0, %v2429_v57, %v2430_v13 }
 0x124   : > { %v3853_v8 = vpop.f32.mrf.mxu1  ;;  %4188 = vmatmul.mubr.msk.f32.gmra.mxu1 %vm363_vm1, %v6262_v42  ;;  %v1268_v61 = vpop.f32.mrf.mxu0 }
 0x125   : > { %v5578_v54 = vadd.f32 %v1258_v9, %v884_v35  ;;  %v899_v58 = vadd.f32 %v3853_v8, %v5329_v10  ;;  %4190 = vmatprep.mubr.msk.f32.mxu1 %vm363_vm1, %v6263_v12  ;;  %v2700_v10 = vrot.slane %v5374_v14, 2  ;;  %v6275_v12 = vld [vmem:[#allocation4_spill] sm:$0xff] }
 0x126   : > { %v893_v18 = vpop.f32.mrf.mxu1  ;;  %v3912_v40 = vpop.f32.mrf.mxu0  ;;  %4247 = vmatmul.mubr.msk.f32.gmra.mxu0 %vm363_vm1, %v4988_v27  ;;  %v224_v27 = vld [vmem:[%s4329_s25 + $0x1a8] sm:$0x3]  ;;  %s3429_s25 = sshll.u32 %s6361_s13, 8 }
 0x127   : > { %v5583_v4 = vadd.f32 %v3909_v19, %v899_v58  ;;  %v894_v62 = vadd.f32 %v893_v18, %v5339_v36  ;;  %4249 = vmatprep.mubr.msk.f32.mxu0 %vm363_vm1, %v4994_v16  ;;  %v6267_v16 = vld [vmem:[#allocation8_spill] sm:$0xff]  ;;  %v2703_v6 = vrot.slane %v224_v27, 2  ;;  %v2702_v20 = vsel %vm942_vm2, %v2700_v10, %v2701_v34  ;;  %v6274_v58 = vld [vmem:[#allocation34_spill] sm:$0xff]  ;;  %s5884_s20 = scalar_lea.vmem %s6069_s3, %s3429_s25 }
 0x128   : > { %v3856_v22 = vpop.f32.mrf.mxu1  ;;  %4191 = vmatmul.mubr.msk.f32.gmra.mxu1 %vm363_vm1, %v6264_v28  ;;  %v1278_v36 = vpop.f32.mrf.mxu0  ;;  %v2432_v9 = vrot.slane %v224_v27, 1  ;;  %v6273_v19 = vld [vmem:[#allocation12_spill] sm:$0xff] }
 0x129   : > { %v5594_v33 = vadd.f32 %v1268_v61, %v894_v62  ;;  %v909_v0 = vadd.f32 %v3856_v22, %v6265_v38  ;;  %4193 = vmatprep.mubr.msk.f32.mxu1 %vm363_vm1, %v6266_v21  ;;  %v2704_v18 = vsel %vm942_vm2, %v2701_v34, %v2703_v6 }
 0x12a   : > { %v903_v55 = vpop.f32.mrf.mxu1  ;;  %v3915_v26 = vpop.f32.mrf.mxu0  ;;  %4250 = vmatmul.mubr.msk.f32.gmra.mxu0 %vm363_vm1, %v6268_v45  ;;  %v2433_v10 = vsel %vm277_vm0, %v2430_v13, %v2432_v9  ;;  %v6279_v13 = vld [vmem:[#allocation37_spill] sm:$0xff] }
 0x12b   : > { %v5602_v31 = vadd.f32 %v3912_v40, %v909_v0  ;;  %v904_v46 = vadd.f32 %v903_v55, %v6267_v16  ;;  %4252 = vmatprep.mubr.msk.f32.mxu0 %vm363_vm1, %v6270_v37  ;;  %v6276_v40 = vld [vmem:[#allocation19_spill] sm:$0xff]  ;;  %v6278_v55 = vld [vmem:[#allocation36_spill] sm:$0xff] }
 0x12c   : > { %v3859_v24 = vpop.f32.mrf.mxu1  ;;  %4194 = vmatmul.mubr.msk.f32.gmra.mxu1 %vm363_vm1, %v6269_v30  ;;  %v1288_v3 = vpop.f32.mrf.mxu0 }
 0x12d   : > { %v5611_v14 = vadd.f32 %v1278_v36, %v904_v46  ;;  %v919_v43 = vadd.f32 %v3859_v24, %v6271_v39  ;;  %4196 = vmatprep.mubr.msk.f32.mxu1 %vm363_vm1, %v6272_v56  ;;  %v6277_v36 = vld [vmem:[#allocation35_spill] sm:$0xff] }
 0x12e   : > { %v913_v2 = vpop.f32.mrf.mxu1  ;;  %v3918_v42 = vpop.f32.mrf.mxu0  ;;  %4253 = vmatmul.mubr.msk.f32.gmra.mxu0 %vm363_vm1, %v6274_v58 }
 0x12f   : > { %v5618_v35 = vadd.f32 %v3915_v26, %v919_v43  ;;  %v914_v8 = vadd.f32 %v913_v2, %v6273_v19  ;;  %4255 = vmatprep.mubr.msk.f32.mxu0 %vm363_vm1, %v2702_v20 }
 0x130   : > { %v3862_v61 = vpop.f32.mrf.mxu1  ;;  %4197 = vmatmul.mubr.msk.f32.gmra.mxu1 %vm363_vm1, %v6275_v12  ;;  %v1298_v28 = vpop.f32.mrf.mxu0 }
 0x131   : > { %v5627_v62 = vadd.f32 %v1288_v3, %v914_v8  ;;  %v929_v22 = vadd.f32 %v3862_v61, %v6276_v40  ;;  %4199 = vmatprep.mubr.msk.f32.mxu1 %vm363_vm1, %v2431_v44 }
 0x132   : > { %v923_v38 = vpop.f32.mrf.mxu1  ;;  %v3921_v27 = vpop.f32.mrf.mxu0  ;;  %4256 = vmatmul.mubr.msk.f32.gmra.mxu0 %vm363_vm1, %v2704_v18 }
 0x133   : > { %v5632_v0 = vadd.f32 %v3918_v42, %v929_v22  ;;  %v924_v21 = vadd.f32 %v923_v38, %v6277_v36 }
 0x134   : > { %v3865_v57 = vpop.f32.mrf.mxu1  ;;  %4200 = vmatmul.mubr.msk.f32.gmra.mxu1 %vm363_vm1, %v2433_v10  ;;  %v1308_v46 = vpop.f32.mrf.mxu0 }
 0x135   : > { %v5637_v34 = vadd.f32 %v1298_v28, %v924_v21  ;;  %v939_v16 = vadd.f32 %v3865_v57, %v6278_v55 }
 0x136   : > { %v933_v26 = vpop.f32.mrf.mxu1  ;;  %v3988_v30 = vpop.f32.mrf.mxu0 }
 0x137   : > { %v5640_v45 = vadd.f32 %v3921_v27, %v939_v16  ;;  %v934_v24 = vadd.f32 %v933_v26, %v6279_v13 }
 0x138   : > { %v3932_v37 = vpop.f32.mrf.mxu1  ;;  %v1698_v43 = vpop.f32.mrf.mxu0 }
 0x139   : > { %v5643_v6 = vadd.f32 %v1308_v46, %v934_v24  ;;  %v1586_v39 = vadd.f32 %v3932_v37, %v5429_v51 }
 0x13a   : > { %v1426_v3 = vpop.f32.mrf.mxu1  ;;  %v3991_v9 = vpop.f32.mrf.mxu0 }
 0x13b   : > { %v5646_v56 = vadd.f32 %v3988_v30, %v1586_v39  ;;  %v1585_v20 = vadd.f32 %v1426_v3, %v5438_v25 }
 0x13c   : > { %v3935_v2 = vpop.f32.mrf.mxu1  ;;  %v1708_v8 = vpop.f32.mrf.mxu0 }
 0x13d   : > { %v5649_v44 = vadd.f32 %v1698_v43, %v1585_v20  ;;  %v1588_v19 = vadd.f32 %v3935_v2, %v5443_v23 }
 0x13e   : > { %v1436_v42 = vpop.f32.mrf.mxu1  ;;  %v3994_v12 = vpop.f32.mrf.mxu0 }
 0x13f   : > { %v5652_v58 = vadd.f32 %v3991_v9, %v1588_v19  ;;  %v1587_v61 = vadd.f32 %v1436_v42, %v5452_v59 }
 0x140   : > { %v3938_v51 = vpop.f32.mrf.mxu1  ;;  %v1718_v22 = vpop.f32.mrf.mxu0 }
 0x141   : > { %v5655_v18 = vadd.f32 %v1708_v8, %v1587_v61  ;;  %v1590_v40 = vadd.f32 %v3938_v51, %v5457_v1 }
 0x142   : > { %v1446_v25 = vpop.f32.mrf.mxu1  ;;  %v3997_v38 = vpop.f32.mrf.mxu0 }
 0x143   : > { %v5658_v28 = vadd.f32 %v3994_v12, %v1590_v40  ;;  %v1589_v10 = vadd.f32 %v1446_v25, %v5466_v53 }
 0x144   : > { %v3941_v23 = vpop.f32.mrf.mxu1  ;;  %v1728_v27 = vpop.f32.mrf.mxu0 }
 0x145   : > { %v5661_v36 = vadd.f32 %v1718_v22, %v1589_v10  ;;  %v1592_v21 = vadd.f32 %v3941_v23, %v5471_v47 }
 0x146   : > { %v1456_v59 = vpop.f32.mrf.mxu1  ;;  %v4000_v16 = vpop.f32.mrf.mxu0 }
 0x147   : > { %v5664_v57 = vadd.f32 %v3997_v38, %v1592_v21  ;;  %v1591_v55 = vadd.f32 %v1456_v59, %v5480_v52 }
 0x148   : > { %v3944_v1 = vpop.f32.mrf.mxu1  ;;  %v1738_v13 = vpop.f32.mrf.mxu0 }
 0x149   : > { %v5667_v46 = vadd.f32 %v1728_v27, %v1591_v55  ;;  %v1594_v26 = vadd.f32 %v3944_v1, %v5485_v48 }
 0x14a   : > { %v1466_v53 = vpop.f32.mrf.mxu1  ;;  %v4003_v37 = vpop.f32.mrf.mxu0 }
 0x14b   : > { %v5670_v24 = vadd.f32 %v4000_v16, %v1594_v26  ;;  %v1593_v30 = vadd.f32 %v1466_v53, %v5494_v60 }
 0x14c   : > { %v3947_v47 = vpop.f32.mrf.mxu1  ;;  %v1748_v3 = vpop.f32.mrf.mxu0 }
 0x14d   : > { %v5673_v39 = vadd.f32 %v1738_v13, %v1593_v30  ;;  %v1596_v43 = vadd.f32 %v3947_v47, %v5499_v17 }
 0x14e   : > { %v1476_v52 = vpop.f32.mrf.mxu1  ;;  %v4006_v2 = vpop.f32.mrf.mxu0 }
 0x14f   : > { %v5676_v20 = vadd.f32 %v4003_v37, %v1596_v43  ;;  %v1595_v9 = vadd.f32 %v1476_v52, %v5508_v63 }
 0x150   : > { %v3950_v48 = vpop.f32.mrf.mxu1  ;;  %v1758_v42 = vpop.f32.mrf.mxu0 }
 0x151   : > { %v5679_v19 = vadd.f32 %v1748_v3, %v1595_v9  ;;  %v1598_v8 = vadd.f32 %v3950_v48, %v5513_v32 }
 0x152   : > { %v1486_v60 = vpop.f32.mrf.mxu1  ;;  %v4009_v51 = vpop.f32.mrf.mxu0 }
 0x153   : > { %v5682_v61 = vadd.f32 %v4006_v2, %v1598_v8  ;;  %v1597_v12 = vadd.f32 %v1486_v60, %v5522_v7 }
 0x154   : > { %v3953_v17 = vpop.f32.mrf.mxu1  ;;  %v1768_v25 = vpop.f32.mrf.mxu0 }
 0x155   : > { %v5685_v40 = vadd.f32 %v1758_v42, %v1597_v12  ;;  %v1600_v22 = vadd.f32 %v3953_v17, %v5527_v49 }
 0x156   : > { %v1496_v63 = vpop.f32.mrf.mxu1  ;;  %v4012_v23 = vpop.f32.mrf.mxu0 }
 0x157   : > { %v5688_v10 = vadd.f32 %v4009_v51, %v1600_v22  ;;  %v1599_v38 = vadd.f32 %v1496_v63, %v5536_v29 }
 0x158   : > { %v3956_v32 = vpop.f32.mrf.mxu1  ;;  %v1778_v59 = vpop.f32.mrf.mxu0 }
 0x159   : > { %v5691_v21 = vadd.f32 %v1768_v25, %v1599_v38  ;;  %v1602_v27 = vadd.f32 %v3956_v32, %v5541_v50 }
 0x15a   : > { %v1506_v7 = vpop.f32.mrf.mxu1  ;;  %v4015_v1 = vpop.f32.mrf.mxu0 }
 0x15b   : > { %v5694_v55 = vadd.f32 %v4012_v23, %v1602_v27  ;;  %v1601_v16 = vadd.f32 %v1506_v7, %v5550_v11 }
 0x15c   : > { %v3959_v49 = vpop.f32.mrf.mxu1  ;;  %v1788_v53 = vpop.f32.mrf.mxu0 }
 0x15d   : > { %v5697_v26 = vadd.f32 %v1778_v59, %v1601_v16  ;;  %v1604_v13 = vadd.f32 %v3959_v49, %v5555_v15 }
 0x15e   : > { %v1516_v29 = vpop.f32.mrf.mxu1  ;;  %v4018_v47 = vpop.f32.mrf.mxu0 }
 0x15f   : > { %v5700_v30 = vadd.f32 %v4015_v1, %v1604_v13  ;;  %v1603_v37 = vadd.f32 %v1516_v29, %v5564_v41 }
 0x160   : > { %v3962_v50 = vpop.f32.mrf.mxu1  ;;  %v1798_v52 = vpop.f32.mrf.mxu0 }
 0x161   : > { %6280 = vst [vmem:[#allocation38_spill] sm:$0xff] %v5700_v30  ;;  %v5703_v43 = vadd.f32 %v1788_v53, %v1603_v37  ;;  %v1606_v3 = vadd.f32 %v3962_v50, %v5569_v5 }
 0x162   : > { %v1526_v11 = vpop.f32.mrf.mxu1  ;;  %v4021_v48 = vpop.f32.mrf.mxu0 }
 0x163   : > { %6281 = vst [vmem:[#allocation39_spill] sm:$0xff] %v5703_v43  ;;  %v5706_v9 = vadd.f32 %v4018_v47, %v1606_v3  ;;  %v1605_v2 = vadd.f32 %v1526_v11, %v5578_v54 }
 0x164   : > { %v3965_v15 = vpop.f32.mrf.mxu1  ;;  %v1808_v60 = vpop.f32.mrf.mxu0 }
 0x165   : > { %6282 = vst [vmem:[#allocation40_spill] sm:$0xff] %v5706_v9  ;;  %v5709_v8 = vadd.f32 %v1798_v52, %v1605_v2  ;;  %v1608_v42 = vadd.f32 %v3965_v15, %v5583_v4 }
 0x166   : > { %v1536_v41 = vpop.f32.mrf.mxu1  ;;  %v4024_v17 = vpop.f32.mrf.mxu0 }
 0x167   : > { %6283 = vst [vmem:[#allocation41_spill] sm:$0xff] %v5709_v8  ;;  %v5712_v12 = vadd.f32 %v4021_v48, %v1608_v42  ;;  %v1607_v51 = vadd.f32 %v1536_v41, %v5594_v33 }
 0x168   : > { %v3968_v5 = vpop.f32.mrf.mxu1  ;;  %v1818_v63 = vpop.f32.mrf.mxu0 }
 0x169   : > { %6284 = vst [vmem:[#allocation42_spill] sm:$0xff] %v5712_v12  ;;  %v5715_v22 = vadd.f32 %v1808_v60, %v1607_v51  ;;  %v1610_v25 = vadd.f32 %v3968_v5, %v5602_v31 }
 0x16a   : > { %v1546_v54 = vpop.f32.mrf.mxu1  ;;  %v4027_v32 = vpop.f32.mrf.mxu0 }
 0x16b   : > { %6285 = vst [vmem:[#allocation43_spill] sm:$0xff] %v5715_v22  ;;  %v5718_v38 = vadd.f32 %v4024_v17, %v1610_v25  ;;  %v1609_v23 = vadd.f32 %v1546_v54, %v5611_v14 }
 0x16c   : > { %v3971_v4 = vpop.f32.mrf.mxu1  ;;  %v1828_v7 = vpop.f32.mrf.mxu0 }
 0x16d   : > { %6286 = vst [vmem:[#allocation44_spill] sm:$0xff] %v5718_v38  ;;  %v5721_v27 = vadd.f32 %v1818_v63, %v1609_v23  ;;  %v1612_v59 = vadd.f32 %v3971_v4, %v5618_v35 }
 0x16e   : > { %v1556_v33 = vpop.f32.mrf.mxu1  ;;  %v4030_v49 = vpop.f32.mrf.mxu0 }
 0x16f   : > { %6287 = vst [vmem:[#allocation16_spill] sm:$0xff] %v5721_v27  ;;  %v5724_v16 = vadd.f32 %v4027_v32, %v1612_v59  ;;  %v1611_v1 = vadd.f32 %v1556_v33, %v5627_v62 }
 0x170   : > { %v3974_v31 = vpop.f32.mrf.mxu1  ;;  %v1838_v29 = vpop.f32.mrf.mxu0 }
 0x171   : > { %6288 = vst [vmem:[#allocation21_spill] sm:$0xff] %v5724_v16  ;;  %v5727_v13 = vadd.f32 %v1828_v7, %v1611_v1  ;;  %v1614_v53 = vadd.f32 %v3974_v31, %v5632_v0 }
 0x172   : > { %v1566_v14 = vpop.f32.mrf.mxu1  ;;  %v4033_v50 = vpop.f32.mrf.mxu0 }
 0x173   : > { %6289 = vst [vmem:[#allocation24_spill] sm:$0xff] %v5727_v13  ;;  %v5730_v37 = vadd.f32 %v4030_v49, %v1614_v53  ;;  %v1613_v47 = vadd.f32 %v1566_v14, %v5637_v34 }
 0x174   : > { %v3977_v35 = vpop.f32.mrf.mxu1  ;;  %v1848_v11 = vpop.f32.mrf.mxu0 }
 0x175   : > { %6290 = vst [vmem:[#allocation26_spill] sm:$0xff] %v5730_v37  ;;  %v5733_v3 = vadd.f32 %v1838_v29, %v1613_v47  ;;  %v1616_v52 = vadd.f32 %v3977_v35, %v5640_v45 }
 0x176   : > { %v1576_v62 = vpop.f32.mrf.mxu1  ;;  %v5739_v15 = vpop.f32.mrf.mxu0 }
 0x177   : > { %6291 = vst [vmem:[#allocation28_spill] sm:$0xff] %v5733_v3  ;;  %v5736_v2 = vadd.f32 %v4033_v50, %v1616_v52  ;;  %v1615_v48 = vadd.f32 %v1576_v62, %v5643_v6 }
 0x178   : > { %v4044_v0 = vpop.f32.mrf.mxu1  ;;  %v5743_v60 = vpop.f32.mrf.mxu0 }
 0x179   : > { %6292 = vst [vmem:[#allocation30_spill] sm:$0xff] %v5736_v2  ;;  %v5741_v42 = vadd.f32 %v1848_v11, %v1615_v48 }
 0x17a   : > { %v1969_v34 = vpop.f32.mrf.mxu1  ;;  %v5745_v41 = vpop.f32.mrf.mxu0 }
 0x17b   : > { %6293 = vst [vmem:[#allocation32_spill] sm:$0xff] %v5741_v42 }
 0x17c   : > { %v4047_v51 = vpop.f32.mrf.mxu1  ;;  %v5747_v17 = vpop.f32.mrf.mxu0 }
 0x17e   : > { %v5749_v45 = vpop.f32.mrf.mxu1  ;;  %v5751_v5 = vpop.f32.mrf.mxu0 }
 0x180   : > { %v5753_v25 = vpop.f32.mrf.mxu1  ;;  %v5755_v6 = vpop.f32.mrf.mxu0 }
 0x182   : > { %v5757_v63 = vpop.f32.mrf.mxu1  ;;  %v5759_v54 = vpop.f32.mrf.mxu0 }
 0x184   : > { %v5761_v23 = vpop.f32.mrf.mxu1  ;;  %v5763_v32 = vpop.f32.mrf.mxu0 }
 0x186   : > { %v5765_v4 = vpop.f32.mrf.mxu1  ;;  %v5767_v59 = vpop.f32.mrf.mxu0 }
 0x188   : > { %v5769_v7 = vpop.f32.mrf.mxu1  ;;  %v5771_v33 = vpop.f32.mrf.mxu0 }
 0x18a   : > { %v5773_v1 = vpop.f32.mrf.mxu1  ;;  %v5775_v49 = vpop.f32.mrf.mxu0 }
 0x18c   : > { %v5777_v31 = vpop.f32.mrf.mxu1  ;;  %v5779_v53 = vpop.f32.mrf.mxu0 }
 0x18e   : > { %v5781_v29 = vpop.f32.mrf.mxu1  ;;  %v5783_v14 = vpop.f32.mrf.mxu0 }
 0x190   : > { %v5785_v47 = vpop.f32.mrf.mxu1  ;;  %v5787_v50 = vpop.f32.mrf.mxu0 }
 0x192   : > { %v5789_v35 = vpop.f32.mrf.mxu1  ;;  %v5791_v52 = vpop.f32.mrf.mxu0 }
 0x194   : > { %v5793_v11 = vpop.f32.mrf.mxu1  ;;  %v5795_v62 = vpop.f32.mrf.mxu0 }
 0x196   : > { %v5797_v48 = vpop.f32.mrf.mxu1  ;;  %v5799_v42 = vpop.f32.mrf.mxu0 }
 0x198   : > { %v5801_v2 = vpop.f32.mrf.mxu1  ;;  %v5803_v3 = vpop.f32.mrf.mxu0 }
 0x199   : > { %6294 = vst [vmem:[#allocation2_spill] sm:$0xff] %v5803_v3 }
 0x19a   : > { %v5805_v37 = vpop.f32.mrf.mxu1  ;;  %v5807_v13 = vpop.f32.mrf.mxu0 }
 0x19b   : > { %6295 = vst [vmem:[#allocation3_spill] sm:$0xff] %v5807_v13 }
 0x19c   : > { %v5809_v16 = vpop.f32.mrf.mxu1  ;;  %v5811_v27 = vpop.f32.mrf.mxu0 }
 0x19d   : > { %6296 = vst [vmem:[#allocation5_spill] sm:$0xff] %v5809_v16  ;;  %6297 = vst [vmem:[#allocation7_spill] sm:$0xff] %v5811_v27 }
 0x19e   : > { %v5813_v38 = vpop.f32.mrf.mxu1  ;;  %v5815_v22 = vpop.f32.mrf.mxu0 }
 0x19f   : > { %6298 = vst [vmem:[#allocation9_spill] sm:$0xff] %v5813_v38  ;;  %6299 = vst [vmem:[#allocation11_spill] sm:$0xff] %v5815_v22 }
 0x1a0   : > { %v5817_v12 = vpop.f32.mrf.mxu1  ;;  %v5819_v8 = vpop.f32.mrf.mxu0 }
 0x1a1   : > { %6300 = vst [vmem:[#allocation13_spill] sm:$0xff] %v5817_v12  ;;  %6301 = vst [vmem:[#allocation15_spill] sm:$0xff] %v5819_v8 }
 0x1a2   : > { %v5821_v9 = vpop.f32.mrf.mxu1  ;;  %v5823_v43 = vpop.f32.mrf.mxu0 }
 0x1a3   : > { %6302 = vst [vmem:[#allocation17_spill] sm:$0xff] %v5821_v9  ;;  %6303 = vst [vmem:[#allocation20_spill] sm:$0xff] %v5823_v43 }
 0x1a4   : > { %v5825_v3 = vpop.f32.mrf.mxu1  ;;  %v5827_v30 = vpop.f32.mrf.mxu0 }
 0x1a5   : > { %6304 = vst [vmem:[#allocation22_spill] sm:$0xff] %v5825_v3  ;;  %6305 = vst [vmem:[#allocation25_spill] sm:$0xff] %v5827_v30 }
 0x1a6   : > { %v5829_v13 = vpop.f32.mrf.mxu1  ;;  %v5831_v16 = vpop.f32.mrf.mxu0 }
 0x1a7   : > { %6306 = vst [vmem:[#allocation27_spill] sm:$0xff] %v5829_v13  ;;  %6307 = vst [vmem:[#allocation29_spill] sm:$0xff] %v5831_v16 }
 0x1a8   : > { %v5833_v27 = vpop.f32.mrf.mxu1  ;;  %v5835_v38 = vpop.f32.mrf.mxu0 }
 0x1a9   : > { %6308 = vst [vmem:[#allocation6_spill] sm:$0xff] %v5833_v27  ;;  %6309 = vst [vmem:[#allocation31_spill] sm:$0xff] %v5835_v38  ;;  %v2129_v38 = vadd.f32 %v4044_v0, %v5646_v56  ;;  %v2130_v56 = vadd.f32 %v5749_v45, %v5655_v18  ;;  %v2132_v18 = vadd.f32 %v5757_v63, %v5661_v36 }
 0x1aa   : > { %v5837_v22 = vpop.f32.mrf.mxu1  ;;  %v5839_v12 = vpop.f32.mrf.mxu0  ;;  %v2135_v36 = vadd.f32 %v5761_v23, %v5664_v57 }
 0x1ab   : > { %6310 = vst [vmem:[#allocation8_spill] sm:$0xff] %v5837_v22  ;;  %6311 = vst [vmem:[#allocation18_spill] sm:$0xff] %v5839_v12 }
 0x1ac   : > { %v5841_v8 = vpop.f32.mrf.mxu1  ;;  %v5843_v9 = vpop.f32.mrf.mxu0 }
 0x1ad   : > { %6312 = vst [vmem:[#allocation33_spill] sm:$0xff] %v5841_v8  ;;  %6313 = vst [vmem:[#allocation14_spill] sm:$0xff] %v5843_v9  ;;  %v2128_v8 = vadd.f32 %v1969_v34, %v5649_v44  ;;  %v2133_v44 = vadd.f32 %v5753_v25, %v5658_v28  ;;  %v5876_v34 = vld [vmem:[%s6068_s2] ss:$0 sm:$0xff] }
 0x1ae   : > { %v5845_v43 = vpop.f32.mrf.mxu1  ;;  %v5847_v3 = vpop.f32.mrf.mxu0 }
 0x1af   : > { %6314 = vst [vmem:[#allocation10_spill] sm:$0xff] %v5845_v43  ;;  %6315 = vst [vmem:[#allocation23_spill] sm:$0xff] %v5847_v3  ;;  %v2397_v3 = vadd.f32 %v5739_v15, %v2129_v38 }
 0x1b0   : > { %v5849_v30 = vpop.f32.mrf.mxu1  ;;  %v5851_v16 = vpop.f32.mrf.mxu0 }
 0x1b1   : > { %6316 = vst [vmem:[#allocation12_spill] sm:$0xff] %v5849_v30  ;;  %6317 = vst [vmem:[#allocation34_spill] sm:$0xff] %v5851_v16  ;;  %v2131_v30 = vadd.f32 %v4047_v51, %v5652_v58 }
 0x1b2   : > { %v5853_v27 = vpop.f32.mrf.mxu1  ;;  %v5856_v22 = vpop.f32.mrf.mxu0 }
 0x1b3   : > { %6318 = vst [vmem:[#allocation4_spill] sm:$0xff] %v5853_v27  ;;  %6319 = vst [vmem:[#allocation19_spill] sm:$0xff] %v5856_v22  ;;  %v2396_v27 = vadd.f32 %v5743_v60, %v2128_v8  ;;  %v2399_v58 = vadd.f32 %v5745_v41, %v2131_v30  ;;  %v2401_v60 = vadd.f32 %v5751_v5, %v2133_v44 }
 0x1b4   : > { %v5858_v12 = vpop.f32.mrf.mxu1  ;;  %v5861_v9 = vpop.f32.mrf.mxu0 }
 0x1b6   : > { %v5863_v43 = vpop.f32.mrf.mxu1  ;;  %v4212_v13 = vpop.f32.mrf.mxu0 }
 0x1b8   : > { %v4156_v16 = vpop.f32.mrf.mxu1  ;;  %v2780_v22 = vpop.f32.mrf.mxu0 }
 0x1b9   : > { %v2669_v0 = vadd.f32 %v4156_v16, %v2397_v3  ;;  %v2398_v16 = vadd.f32 %v5747_v17, %v2130_v56  ;;  %v2400_v56 = vadd.f32 %v5755_v6, %v2132_v18 }
 0x1ba   : > { %v2509_v38 = vpop.f32.mrf.mxu1  ;;  %v4215_v8 = vpop.f32.mrf.mxu0 }
 0x1bb   : > { %v2940_v15 = vadd.f32 %v4212_v13, %v2669_v0  ;;  %v2668_v51 = vadd.f32 %v2509_v38, %v2396_v27  ;;  %v2137_v38 = vadd.f32 %v5769_v7, %v5670_v24 }
 0x1bc   : > { %v4159_v28 = vpop.f32.mrf.mxu1  ;;  %v2790_v27 = vpop.f32.mrf.mxu0 }
 0x1bd   : > { %v2979_v3 = vadd.f32 %v5876_v34, %v2940_v15  ;;  %v2939_v30 = vadd.f32 %v2780_v22, %v2668_v51  ;;  %v2671_v13 = vadd.f32 %v4159_v28, %v2399_v58  ;;  %v2134_v22 = vadd.f32 %v5765_v4, %v5667_v46 }
 0x1be   : > { %v2519_v41 = vpop.f32.mrf.mxu1  ;;  %v4218_v17 = vpop.f32.mrf.mxu0  ;;  %v2403_v15 = vadd.f32 %v5759_v54, %v2135_v36  ;;  %v2138_v36 = vadd.f32 %v5781_v29, %v5679_v19 }
 0x1bf   : > { %3012 = vst.msk [vmem:[%s5884_s20 + $0x8] sm:$0xff] %vm3010_vm3, %v2979_v3  ;;  %v2978_v45 = vadd.f32 %v5876_v34, %v2939_v30  ;;  %v2942_v25 = vadd.f32 %v4215_v8, %v2671_v13  ;;  %v2670_v63 = vadd.f32 %v2519_v41, %v2398_v16  ;;  %v2136_v8 = vadd.f32 %v5773_v1, %v5673_v39 }
 0x1c0   : > { %v4162_v0 = vpop.f32.mrf.mxu1  ;;  %v2800_v44 = vpop.f32.mrf.mxu0  ;;  %v2402_v28 = vadd.f32 %v5763_v32, %v2134_v22  ;;  %v2405_v3 = vadd.f32 %v5767_v59, %v2137_v38  ;;  %v2139_v13 = vadd.f32 %v5777_v31, %v5676_v20  ;;  %v2143_v38 = vadd.f32 %v5793_v11, %v5688_v10 }
 0x1c1   : > { %3011 = vst.msk [vmem:[%s5884_s20] sm:$0xff] %vm3010_vm3, %v2978_v45  ;;  %v2981_v5 = vadd.f32 %v5876_v34, %v2942_v25  ;;  %v2941_v57 = vadd.f32 %v2790_v27, %v2670_v63  ;;  %v2673_v23 = vadd.f32 %v4162_v0, %v2401_v60  ;;  %v2404_v60 = vadd.f32 %v5771_v33, %v2136_v8 }
 0x1c2   : > { %v2529_v58 = vpop.f32.mrf.mxu1  ;;  %v4221_v51 = vpop.f32.mrf.mxu0  ;;  %v2141_v25 = vadd.f32 %v5785_v47, %v5682_v61  ;;  %v2140_v0 = vadd.f32 %v5789_v35, %v5685_v40 }
 0x1c3   : > { %3014 = vst.msk [vmem:[%s5884_s20 + $0x18] sm:$0xff] %vm3010_vm3, %v2981_v5  ;;  %v2980_v6 = vadd.f32 %v5876_v34, %v2941_v57  ;;  %v2944_v46 = vadd.f32 %v4218_v17, %v2673_v23  ;;  %v2672_v4 = vadd.f32 %v2529_v58, %v2400_v56  ;;  %v2407_v17 = vadd.f32 %v5775_v49, %v2139_v13  ;;  %v6320_v13 = vld [vmem:[#allocation38_spill] sm:$0xff] }
 0x1c4   : > { %v4165_v18 = vpop.f32.mrf.mxu1  ;;  %v2810_v16 = vpop.f32.mrf.mxu0  ;;  %v2406_v5 = vadd.f32 %v5779_v53, %v2138_v36  ;;  %v2409_v23 = vadd.f32 %v5783_v14, %v2141_v25  ;;  %v6323_v36 = vld [vmem:[#allocation39_spill] sm:$0xff] }
 0x1c5   : > { %3013 = vst.msk [vmem:[%s5884_s20 + $0x10] sm:$0xff] %vm3010_vm3, %v2980_v6  ;;  %v2983_v24 = vadd.f32 %v5876_v34, %v2944_v46  ;;  %v2943_v54 = vadd.f32 %v2800_v44, %v2672_v4  ;;  %v2675_v7 = vadd.f32 %v4165_v18, %v2403_v15  ;;  %v2408_v15 = vadd.f32 %v5787_v50, %v2140_v0 }
 0x1c6   : > { %v2539_v30 = vpop.f32.mrf.mxu1  ;;  %v4224_v27 = vpop.f32.mrf.mxu0  ;;  %v2142_v46 = vadd.f32 %v5797_v48, %v5691_v21  ;;  %v2411_v18 = vadd.f32 %v5791_v52, %v2143_v38 }
 0x1c7   : > { %3016 = vst.msk [vmem:[%s5884_s20 + $0x28] sm:$0xff] %vm3010_vm3, %v2983_v24  ;;  %v2982_v39 = vadd.f32 %v5876_v34, %v2943_v54  ;;  %v2946_v32 = vadd.f32 %v4221_v51, %v2675_v7  ;;  %v2674_v1 = vadd.f32 %v2539_v30, %v2402_v28  ;;  %v2145_v51 = vadd.f32 %v5801_v2, %v5694_v55 }
 0x1c8   : > { %v4168_v41 = vpop.f32.mrf.mxu1  ;;  %v2820_v45 = vpop.f32.mrf.mxu0  ;;  %v2144_v24 = vadd.f32 %v5805_v37, %v5697_v26  ;;  %v2410_v7 = vadd.f32 %v5795_v62, %v2142_v46 }
 0x1c9   : > { %3015 = vst.msk [vmem:[%s5884_s20 + $0x20] sm:$0xff] %vm3010_vm3, %v2982_v39  ;;  %v2985_v59 = vadd.f32 %v5876_v34, %v2946_v32  ;;  %v2945_v20 = vadd.f32 %v2810_v16, %v2674_v1  ;;  %v2677_v31 = vadd.f32 %v4168_v41, %v2405_v3  ;;  %v2413_v3 = vadd.f32 %v5799_v42, %v2145_v51  ;;  %v6321_v39 = vld [vmem:[#allocation5_spill] sm:$0xff] }
 0x1ca   : > { %v2549_v63 = vpop.f32.mrf.mxu1  ;;  %v4227_v56 = vpop.f32.mrf.mxu0  ;;  %v2147_v32 = vadd.f32 %v6321_v39, %v6320_v13  ;;  %v6339_v39 = vld [vmem:[#allocation20_spill] sm:$0xff] }
 0x1cb   : > { %3018 = vst.msk [vmem:[%s5884_s20 + $0x38] sm:$0xff] %vm3010_vm3, %v2985_v59  ;;  %v2984_v33 = vadd.f32 %v5876_v34, %v2945_v20  ;;  %v2948_v19 = vadd.f32 %v4224_v27, %v2677_v31  ;;  %v2676_v29 = vadd.f32 %v2549_v63, %v2404_v60  ;;  %v6322_v27 = vld [vmem:[#allocation2_spill] sm:$0xff]  ;;  %v6324_v59 = vld [vmem:[#allocation9_spill] sm:$0xff]  ;;  %v6325_v63 = vld [vmem:[#allocation40_spill] sm:$0xff] }
 0x1cc   : > { %v4171_v22 = vpop.f32.mrf.mxu1  ;;  %v2830_v57 = vpop.f32.mrf.mxu0  ;;  %v2412_v60 = vadd.f32 %v6322_v27, %v2144_v24  ;;  %v2146_v20 = vadd.f32 %v6324_v59, %v6323_v36  ;;  %v6336_v24 = vld [vmem:[#allocation27_spill] sm:$0xff]  ;;  %v6340_v27 = vld [vmem:[#allocation16_spill] sm:$0xff]  ;;  %v6342_v59 = vld [vmem:[#allocation25_spill] sm:$0xff] }
 0x1cd   : > { %3017 = vst.msk [vmem:[%s5884_s20 + $0x30] sm:$0xff] %vm3010_vm3, %v2984_v33  ;;  %v2987_v61 = vadd.f32 %v5876_v34, %v2948_v19  ;;  %v2947_v49 = vadd.f32 %v2820_v45, %v2676_v29  ;;  %v2679_v47 = vadd.f32 %v4171_v22, %v2407_v17  ;;  %v6326_v17 = vld [vmem:[#allocation13_spill] sm:$0xff]  ;;  %v6327_v29 = vld [vmem:[#allocation3_spill] sm:$0xff] }
 0x1ce   : > { %v2559_v44 = vpop.f32.mrf.mxu1  ;;  %v4230_v58 = vpop.f32.mrf.mxu0  ;;  %v2149_v33 = vadd.f32 %v6326_v17, %v6325_v63  ;;  %v6343_v63 = vld [vmem:[#allocation29_spill] sm:$0xff] }
 0x1cf   : > { %3020 = vst.msk [vmem:[%s5884_s20 + $0x48] sm:$0xff] %vm3010_vm3, %v2987_v61  ;;  %v2986_v40 = vadd.f32 %v5876_v34, %v2947_v49  ;;  %v2950_v53 = vadd.f32 %v4227_v56, %v2679_v47  ;;  %v2678_v35 = vadd.f32 %v2559_v44, %v2406_v5  ;;  %v2415_v56 = vadd.f32 %v6327_v29, %v2147_v32  ;;  %v6328_v49 = vld [vmem:[#allocation41_spill] sm:$0xff]  ;;  %v6330_v44 = vld [vmem:[#allocation7_spill] sm:$0xff] }
 0x1d0   : > { %v4174_v6 = vpop.f32.mrf.mxu1  ;;  %v2840_v4 = vpop.f32.mrf.mxu0  ;;  %v6329_v47 = vld [vmem:[#allocation17_spill] sm:$0xff]  ;;  %v2414_v38 = vadd.f32 %v6330_v44, %v2146_v20  ;;  %v6348_v44 = vld [vmem:[#allocation10_spill] sm:$0xff] }
 0x1d1   : > { %3019 = vst.msk [vmem:[%s5884_s20 + $0x40] sm:$0xff] %vm3010_vm3, %v2986_v40  ;;  %v2989_v14 = vadd.f32 %v5876_v34, %v2950_v53  ;;  %v2949_v10 = vadd.f32 %v2830_v57, %v2678_v35  ;;  %v2681_v11 = vadd.f32 %v4174_v6, %v2409_v23  ;;  %v2148_v57 = vadd.f32 %v6329_v47, %v6328_v49  ;;  %v6345_v29 = vld [vmem:[#allocation33_spill] sm:$0xff]  ;;  %v6346_v49 = vld [vmem:[#allocation31_spill] sm:$0xff] }
 0x1d2   : > { %v2569_v8 = vpop.f32.mrf.mxu1  ;;  %v4233_v28 = vpop.f32.mrf.mxu0 }
 0x1d3   : > { %3022 = vst.msk [vmem:[%s5884_s20 + $0x58] sm:$0xff] %vm3010_vm3, %v2989_v14  ;;  %v2988_v50 = vadd.f32 %v5876_v34, %v2949_v10  ;;  %v2952_v21 = vadd.f32 %v4230_v58, %v2681_v11  ;;  %v2680_v48 = vadd.f32 %v2569_v8, %v2408_v15  ;;  %v6331_v15 = vld [vmem:[#allocation11_spill] sm:$0xff]  ;;  %v6332_v14 = vld [vmem:[#allocation42_spill] sm:$0xff] }
 0x1d4   : > { %v4177_v54 = vpop.f32.mrf.mxu1  ;;  %v2850_v16 = vpop.f32.mrf.mxu0  ;;  %v2417_v6 = vadd.f32 %v6331_v15, %v2149_v33  ;;  %v6333_v10 = vld [vmem:[#allocation22_spill] sm:$0xff] }
 0x1d5   : > { %3021 = vst.msk [vmem:[%s5884_s20 + $0x50] sm:$0xff] %vm3010_vm3, %v2988_v50  ;;  %v2991_v55 = vadd.f32 %v5876_v34, %v2952_v21  ;;  %v2951_v2 = vadd.f32 %v2840_v4, %v2680_v48  ;;  %v2683_v52 = vadd.f32 %v4177_v54, %v2411_v18  ;;  %v2151_v11 = vadd.f32 %v6333_v10, %v6332_v14  ;;  %v6334_v50 = vld [vmem:[#allocation15_spill] sm:$0xff]  ;;  %v6349_v15 = vld [vmem:[#allocation26_spill] sm:$0xff] }
 0x1d6   : > { %v2579_v30 = vpop.f32.mrf.mxu1  ;;  %v4236_v1 = vpop.f32.mrf.mxu0  ;;  %v2416_v21 = vadd.f32 %v6334_v50, %v2148_v57  ;;  %v6351_v10 = vld [vmem:[#allocation18_spill] sm:$0xff]  ;;  %v6352_v50 = vld [vmem:[#allocation28_spill] sm:$0xff] }
 0x1d7   : > { %3024 = vst.msk [vmem:[%s5884_s20 + $0x68] sm:$0xff] %vm3010_vm3, %v2991_v55  ;;  %v2990_v26 = vadd.f32 %v5876_v34, %v2951_v2  ;;  %v2954_v37 = vadd.f32 %v4233_v28, %v2683_v52  ;;  %v2682_v62 = vadd.f32 %v2579_v30, %v2410_v7  ;;  %v6335_v28 = vld [vmem:[#allocation43_spill] sm:$0xff]  ;;  %v2419_v32 = vadd.f32 %v6339_v39, %v2151_v11 }
 0x1d8   : > { %v4180_v41 = vpop.f32.mrf.mxu1  ;;  %v2860_v25 = vpop.f32.mrf.mxu0  ;;  %v2150_v54 = vadd.f32 %v6336_v24, %v6335_v28  ;;  %v6354_v24 = vld [vmem:[#allocation14_spill] sm:$0xff] }
 0x1d9   : > { %3023 = vst.msk [vmem:[%s5884_s20 + $0x60] sm:$0xff] %vm3010_vm3, %v2990_v26  ;;  %v2993_v42 = vadd.f32 %v5876_v34, %v2954_v37  ;;  %v2953_v31 = vadd.f32 %v2850_v16, %v2682_v62  ;;  %v2685_v45 = vadd.f32 %v4180_v41, %v2413_v3  ;;  %v6337_v16 = vld [vmem:[#allocation44_spill] sm:$0xff]  ;;  %v6338_v3 = vld [vmem:[#allocation6_spill] sm:$0xff] }
 0x1da   : > { %v2589_v19 = vpop.f32.mrf.mxu1  ;;  %v4239_v61 = vpop.f32.mrf.mxu0  ;;  %v2153_v30 = vadd.f32 %v6338_v3, %v6337_v16  ;;  %v2418_v20 = vadd.f32 %v6342_v59, %v2150_v54  ;;  %v6355_v16 = vld [vmem:[#allocation23_spill] sm:$0xff] }
 0x1db   : > { %3026 = vst.msk [vmem:[%s5884_s20 + $0x78] sm:$0xff] %vm3010_vm3, %v2993_v42  ;;  %v2992_v0 = vadd.f32 %v5876_v34, %v2953_v31  ;;  %v2956_v22 = vadd.f32 %v4236_v1, %v2685_v45  ;;  %v2684_v5 = vadd.f32 %v2589_v19, %v2412_v60  ;;  %v6341_v60 = vld [vmem:[#allocation8_spill] sm:$0xff]  ;;  %v6344_v19 = vld [vmem:[#allocation21_spill] sm:$0xff] }
 0x1dc   : > { %v4183_v23 = vpop.f32.mrf.mxu1  ;;  %v2870_v58 = vpop.f32.mrf.mxu0  ;;  %v2152_v41 = vadd.f32 %v6341_v60, %v6340_v27  ;;  %v2421_v17 = vadd.f32 %v6343_v63, %v2153_v30 }
 0x1dd   : > { %3025 = vst.msk [vmem:[%s5884_s20 + $0x70] sm:$0xff] %vm3010_vm3, %v2992_v0  ;;  %v2995_v40 = vadd.f32 %v5876_v34, %v2956_v22  ;;  %v2955_v53 = vadd.f32 %v2860_v25, %v2684_v5  ;;  %v2687_v35 = vadd.f32 %v4183_v23, %v2415_v56  ;;  %v2155_v56 = vadd.f32 %v6345_v29, %v6344_v19  ;;  %v6347_v23 = vld [vmem:[#allocation24_spill] sm:$0xff] }
 0x1de   : > { %v2599_v46 = vpop.f32.mrf.mxu1  ;;  %v4242_v18 = vpop.f32.mrf.mxu0  ;;  %v2420_v47 = vadd.f32 %v6346_v49, %v2152_v41  ;;  %v6358_v41 = vld [vmem:[#allocation32_spill] sm:$0xff] }
 0x1df   : > { %3028 = vst.msk [vmem:[%s5884_s20 + $0x88] sm:$0xff] %vm3010_vm3, %v2995_v40  ;;  %v2994_v4 = vadd.f32 %v5876_v34, %v2955_v53  ;;  %v2958_v51 = vadd.f32 %v4239_v61, %v2687_v35  ;;  %v2686_v8 = vadd.f32 %v2599_v46, %v2414_v38  ;;  %v2154_v38 = vadd.f32 %v6348_v44, %v6347_v23 }
 0x1e0   : > { %v4186_v48 = vpop.f32.mrf.mxu1  ;;  %v2880_v52 = vpop.f32.mrf.mxu0  ;;  %v2423_v11 = vadd.f32 %v6351_v10, %v2155_v56 }
 0x1e1   : > { %3027 = vst.msk [vmem:[%s5884_s20 + $0x80] sm:$0xff] %vm3010_vm3, %v2994_v4  ;;  %v2997_v7 = vadd.f32 %v5876_v34, %v2958_v51  ;;  %v2957_v55 = vadd.f32 %v2870_v58, %v2686_v8  ;;  %v2689_v2 = vadd.f32 %v4186_v48, %v2417_v6  ;;  %v6350_v6 = vld [vmem:[#allocation12_spill] sm:$0xff]  ;;  %v2422_v54 = vadd.f32 %v6354_v24, %v2154_v38 }
 0x1e2   : > { %v2609_v13 = vpop.f32.mrf.mxu1  ;;  %v4245_v1 = vpop.f32.mrf.mxu0  ;;  %v2157_v46 = vadd.f32 %v6350_v6, %v6349_v15 }
 0x1e3   : > { %3030 = vst.msk [vmem:[%s5884_s20 + $0x98] sm:$0xff] %vm3010_vm3, %v2997_v7  ;;  %v2996_v26 = vadd.f32 %v5876_v34, %v2957_v55  ;;  %v2960_v37 = vadd.f32 %v4242_v18, %v2689_v2  ;;  %v2688_v62 = vadd.f32 %v2609_v13, %v2416_v21  ;;  %v6353_v21 = vld [vmem:[#allocation4_spill] sm:$0xff]  ;;  %v6356_v13 = vld [vmem:[#allocation30_spill] sm:$0xff] }
 0x1e4   : > { %v4189_v36 = vpop.f32.mrf.mxu1  ;;  %v2890_v25 = vpop.f32.mrf.mxu0  ;;  %v2156_v48 = vadd.f32 %v6353_v21, %v6352_v50  ;;  %v2425_v3 = vadd.f32 %v6355_v16, %v2157_v46  ;;  %v2159_v39 = vadd.f32 %v5858_v12, %v6356_v13 }
 0x1e5   : > { %3029 = vst.msk [vmem:[%s5884_s20 + $0x90] sm:$0xff] %vm3010_vm3, %v2996_v26  ;;  %v2999_v42 = vadd.f32 %v5876_v34, %v2960_v37  ;;  %v2959_v31 = vadd.f32 %v2880_v52, %v2688_v62  ;;  %v2691_v45 = vadd.f32 %v4189_v36, %v2419_v32  ;;  %v2158_v36 = vadd.f32 %v5863_v43, %v6358_v41 }
 0x1e6   : > { %v2619_v33 = vpop.f32.mrf.mxu1  ;;  %v4248_v61 = vpop.f32.mrf.mxu0 }
 0x1e7   : > { %3032 = vst.msk [vmem:[%s5884_s20 + $0xa8] sm:$0xff] %vm3010_vm3, %v2999_v42  ;;  %v2998_v0 = vadd.f32 %v5876_v34, %v2959_v31  ;;  %v2962_v22 = vadd.f32 %v4245_v1, %v2691_v45  ;;  %v2690_v5 = vadd.f32 %v2619_v33, %v2418_v20  ;;  %v6357_v1 = vld [vmem:[#allocation34_spill] sm:$0xff]  ;;  %v6359_v45 = vld [vmem:[#allocation19_spill] sm:$0xff]  ;;  %v2426_v29 = vadd.f32 %v5861_v9, %v2158_v36 }
 0x1e8   : > { %v4192_v57 = vpop.f32.mrf.mxu1  ;;  %v2900_v58 = vpop.f32.mrf.mxu0  ;;  %v2424_v27 = vadd.f32 %v6357_v1, %v2156_v48 }
 0x1e9   : > { %3031 = vst.msk [vmem:[%s5884_s20 + $0xa0] sm:$0xff] %vm3010_vm3, %v2998_v0  ;;  %v3001_v40 = vadd.f32 %v5876_v34, %v2962_v22  ;;  %v2961_v53 = vadd.f32 %v2890_v25, %v2690_v5  ;;  %v2693_v35 = vadd.f32 %v4192_v57, %v2421_v17  ;;  %v2427_v25 = vadd.f32 %v6359_v45, %v2159_v39 }
 0x1ea   : > { %v2629_v14 = vpop.f32.mrf.mxu1  ;;  %v4251_v18 = vpop.f32.mrf.mxu0 }
 0x1eb   : > { %3034 = vst.msk [vmem:[%s5884_s20 + $0xb8] sm:$0xff] %vm3010_vm3, %v3001_v40  ;;  %v3000_v4 = vadd.f32 %v5876_v34, %v2961_v53  ;;  %v2964_v51 = vadd.f32 %v4248_v61, %v2693_v35  ;;  %v2692_v8 = vadd.f32 %v2629_v14, %v2420_v47 }
 0x1ec   : > { %v4195_v28 = vpop.f32.mrf.mxu1  ;;  %v2910_v52 = vpop.f32.mrf.mxu0 }
 0x1ed   : > { %3033 = vst.msk [vmem:[%s5884_s20 + $0xb0] sm:$0xff] %vm3010_vm3, %v3000_v4  ;;  %v3003_v7 = vadd.f32 %v5876_v34, %v2964_v51  ;;  %v2963_v55 = vadd.f32 %v2900_v58, %v2692_v8  ;;  %v2695_v2 = vadd.f32 %v4195_v28, %v2423_v11 }
 0x1ee   : > { %v2639_v30 = vpop.f32.mrf.mxu1  ;;  %v4254_v62 = vpop.f32.mrf.mxu0 }
 0x1ef   : > { %3036 = vst.msk [vmem:[%s5884_s20 + $0xc8] sm:$0xff] %vm3010_vm3, %v3003_v7  ;;  %v3002_v32 = vadd.f32 %v5876_v34, %v2963_v55  ;;  %v2966_v26 = vadd.f32 %v4251_v18, %v2695_v2  ;;  %v2694_v37 = vadd.f32 %v2639_v30, %v2422_v54 }
 0x1f0   : > { %v4198_v60 = vpop.f32.mrf.mxu1  ;;  %v2920_v42 = vpop.f32.mrf.mxu0 }
 0x1f1   : > { %3035 = vst.msk [vmem:[%s5884_s20 + $0xc0] sm:$0xff] %vm3010_vm3, %v3002_v32  ;;  %v3005_v59 = vadd.f32 %v5876_v34, %v2966_v26  ;;  %v2965_v12 = vadd.f32 %v2910_v52, %v2694_v37  ;;  %v2697_v20 = vadd.f32 %v4198_v60, %v2425_v3 }
 0x1f2   : > { %v2649_v31 = vpop.f32.mrf.mxu1  ;;  %v4257_v43 = vpop.f32.mrf.mxu0 }
 0x1f3   : > { %3038 = vst.msk [vmem:[%s5884_s20 + $0xd8] sm:$0xff] %vm3010_vm3, %v3005_v59  ;;  %v3004_v63 = vadd.f32 %v5876_v34, %v2965_v12  ;;  %v2968_v17 = vadd.f32 %v4254_v62, %v2697_v20  ;;  %v2696_v33 = vadd.f32 %v2649_v31, %v2424_v27 }
 0x1f4   : > { %v4201_v19 = vpop.f32.mrf.mxu1  ;;  %v2930_v57 = vpop.f32.mrf.mxu0 }
 0x1f5   : > { %3037 = vst.msk [vmem:[%s5884_s20 + $0xd0] sm:$0xff] %vm3010_vm3, %v3004_v63  ;;  %v3007_v56 = vadd.f32 %v5876_v34, %v2968_v17  ;;  %v2967_v0 = vadd.f32 %v2920_v42, %v2696_v33  ;;  %v2699_v22 = vadd.f32 %v4201_v19, %v2427_v25 }
 0x1f6   : > { %v2659_v5 = vpop.f32.mrf.mxu1 }
 0x1f7   : > { %3040 = vst.msk [vmem:[%s5884_s20 + $0xe8] sm:$0xff] %vm3010_vm3, %v3007_v56  ;;  %v3006_v61 = vadd.f32 %v5876_v34, %v2967_v0  ;;  %v2970_v49 = vadd.f32 %v4257_v43, %v2699_v22  ;;  %v2698_v47 = vadd.f32 %v2659_v5, %v2426_v29 }
 0x1f9   : > { %3039 = vst.msk [vmem:[%s5884_s20 + $0xe0] sm:$0xff] %vm3010_vm3, %v3006_v61  ;;  %v3009_v23 = vadd.f32 %v5876_v34, %v2970_v49  ;;  %v2969_v9 = vadd.f32 %v2930_v57, %v2698_v47 }
 0x1fb   : > { %3042 = vst.msk [vmem:[%s5884_s20 + $0xf8] sm:$0xff] %vm3010_vm3, %v3009_v23  ;;  %v3008_v44 = vadd.f32 %v5876_v34, %v2969_v9 }
 0x1fd   : > { %3041 = vst.msk [vmem:[%s5884_s20 + $0xf0] sm:$0xff] %vm3010_vm3, %v3008_v44 }
 0x1fe PF: > { %s13_s12 = sadd.s32 1, %s4281_s12  }
 0x1ff   : > { %p10_p4 = scmp.ge.s32.totalorder %s13_s12, 4  }
 0x201   :  { %12 = sbr.rel (!%p10_p4) target bundleno = 1 (0x1), region = 70 }

</bundles_post_ra>
